<compile_context>
chip_gen: v7x
topology: tpu7x:2x2x1
jax: 0.10.0
libtpu: 0.0.40
codegen_flags: <defaults>
</compile_context>

<pallas_src>
import jax
import jax.numpy as jnp
from jax import lax
from jax.experimental import pallas as pl
from jax.experimental.pallas import tpu as pltpu
import numpy as np

_B = 8  # images per grid step (8 keeps every slice 8-sublane aligned)


# ----------------------------------------------------------------------------
# Host-side, one-time parameter re-layout
# ----------------------------------------------------------------------------
def prepare_kernel_params(params):
    """Fold dx taps, channel mixing, width padding, output-column parity split,
    pooling layout and the FC flatten order into the weights (done once)."""
    w1, b1, w2, b2, wf, bf = [np.asarray(p, np.float32) for p in params]
    assert w1.shape == (3, 3, 1, 8) and w2.shape == (3, 3, 8, 16)
    assert wf.shape == (16 * 7 * 7, 10) and bf.shape == (10,)

    # conv1 banded matrices, output lane = parity*128 + (w//2)*8 + c
    m1 = np.zeros((3, 28, 256), np.float32)
    for dy in range(3):
        for wo in range(28):
            base = (wo % 2) * 128 + (wo // 2) * 8
            for dx in range(3):
                u = wo + dx - 1                      # width pad = 1 folded in
                if 0 <= u < 28:
                    m1[dy, u, base:base + 8] = w1[dy, dx, 0, :]
    b1_row = np.zeros((1, 256), np.float32)
    for par in range(2):
        for wp in range(14):
            b1_row[0, par * 128 + wp * 8: par * 128 + (wp + 1) * 8] = b1

    # conv2 banded matrices: input lane = w_in*8 + ci (pool1 layout, lanes
    # 112..127 are zero padding), output lane = parity*128 + (w//2)*16 + co
    m2 = np.zeros((3, 128, 256), np.float32)
    for dy in range(3):
        for wo in range(14):
            base = (wo % 2) * 128 + (wo // 2) * 16
            for dx in range(3):
                u = wo + dx - 1
                if 0 <= u < 14:
                    m2[dy, u * 8:(u + 1) * 8, base:base + 16] = w2[dy, dx]
    b2_row = np.zeros((1, 256), np.float32)
    for par in range(2):
        for wp in range(7):
            b2_row[0, par * 128 + wp * 16: par * 128 + (wp + 1) * 16] = b2

    # FC: pooled slab row h has lanes w*16 + c (w=0..6, c=0..15, lanes
    # 112..127 zero).  Fold PyTorch's NCHW flatten index c*49 + h*7 + w and
    # pad the 10 classes to 128 lanes (lane-dense output store).
    wf_g = np.zeros((7, 128, 128), np.float32)
    for c in range(16):
        for h in range(7):
            for w in range(7):
                wf_g[h, w * 16 + c, :10] = wf[c * 49 + h * 7 + w]
    bf_row = np.zeros((1, 128), np.float32)
    bf_row[0, :10] = bf

    # Matmul operands in bf16 (single-pass MXU); biases stay f32.
    return (jnp.asarray(m1, jnp.bfloat16), jnp.asarray(b1_row),
            jnp.asarray(m2, jnp.bfloat16), jnp.asarray(b2_row),
            jnp.asarray(wf_g, jnp.bfloat16), jnp.asarray(bf_row))


# ----------------------------------------------------------------------------
# Fused kernel: one block of B images per grid step, everything in VMEM.
# Activation layout inside a block: row = h*B + b ("h-major"), lanes = packed
# (w, c) with even/odd output columns split across the two 128-lane halves.
# ----------------------------------------------------------------------------
def _fused_cnn_kernel(x_ref, m1_ref, b1_ref, m2_ref, b2_ref, wf_ref, bf_ref,
                      o_ref, y1_ref, y2_ref, pad2_ref):
    f32, bf16 = jnp.float32, jnp.bfloat16
    B = _B

    # ---- conv1 + relu: 3 whole-block matmuls (one per kernel row dy) --------
    acc1 = jnp.dot(x_ref[0:28 * B, :].astype(bf16), m1_ref[0],
                   preferred_element_type=f32)
    for dy in (1, 2):
        acc1 = acc1 + jnp.dot(x_ref[dy * B:(dy + 28) * B, :].astype(bf16),
                              m1_ref[dy], preferred_element_type=f32)
    y1_ref[...] = jnp.maximum(acc1 + b1_ref[...], 0.0)          # (28B, 256)

    # ---- pool1 (2x2 max) + height-pad for conv2: pure VPU maxes -------------
    # h-pair  -> max of two adjacent 8-row-aligned blocks (h-major layout)
    # w-pair  -> max of the two 128-lane halves (parity-split conv output)
    pad2_ref[0:B, :] = jnp.zeros((B, 128), f32)                  # pad row 0
    pad2_ref[15 * B:16 * B, :] = jnp.zeros((B, 128), f32)        # pad row 15
    for h in range(14):
        pair = jnp.maximum(y1_ref[(2 * h) * B:(2 * h + 1) * B, :],
                           y1_ref[(2 * h + 1) * B:(2 * h + 2) * B, :])
        pad2_ref[(h + 1) * B:(h + 2) * B, :] = jnp.maximum(pair[:, 0:128],
                                                           pair[:, 128:256])

    # ---- conv2 + relu: 3 whole-block matmuls --------------------------------
    acc2 = jnp.dot(pad2_ref[0:14 * B, :].astype(bf16), m2_ref[0],
                   preferred_element_type=f32)
    for dy in (1, 2):
        acc2 = acc2 + jnp.dot(pad2_ref[dy * B:(dy + 14) * B, :].astype(bf16),
                              m2_ref[dy], preferred_element_type=f32)
    y2_ref[...] = jnp.maximum(acc2 + b2_ref[...], 0.0)           # (14B, 256)

    # ---- pool2 + fc: 7 matmuls with M = B (flatten order folded in weight) --
    acc = jnp.zeros((B, 128), f32)
    for h in range(7):
        pair = jnp.maximum(y2_ref[(2 * h) * B:(2 * h + 1) * B, :],
                           y2_ref[(2 * h + 1) * B:(2 * h + 2) * B, :])
        pooled = jnp.maximum(pair[:, 0:128], pair[:, 128:256])   # (B, 128)
        acc = acc + jnp.dot(pooled.astype(bf16), wf_ref[h],
                            preferred_element_type=f32)
    o_ref[...] = acc + bf_ref[...]                               # (B, 128) vst


def _fused_forward(x_hm, g, kparams):
    m1, b1r, m2, b2r, wfg, bfr = kparams

    def _w(arr):                        # whole-array weight spec (loaded once)
        r = arr.ndim
        return pl.BlockSpec(arr.shape, lambda i: (0,) * r)

    return pl.pallas_call(
        _fused_cnn_kernel,
        out_shape=jax.ShapeDtypeStruct((g * _B, 128), jnp.float32),
        grid=(g,),
        in_specs=[pl.BlockSpec((30 * _B, 28), lambda i: (i, 0)),
                  _w(m1), _w(b1r), _w(m2), _w(b2r), _w(wfg), _w(bfr)],
        out_specs=pl.BlockSpec((_B, 128), lambda i: (i, 0)),
        scratch_shapes=[pltpu.VMEM((28 * _B, 256), jnp.float32),  # conv1 out
                        pltpu.VMEM((14 * _B, 256), jnp.float32),  # conv2 out
                        pltpu.VMEM((16 * _B, 128), jnp.float32)], # padded pool1
        compiler_params=pltpu.CompilerParams(
            dimension_semantics=("parallel",)),   # v7x: 2 TCs split the blocks
    )(x_hm, m1, b1r, m2, b2r, wfg, bfr)


@jax.jit
def cnn_forward(x_nchw, kparams):
    n = x_nchw.shape[0]
    g = -(-n // _B)                                   # blocks of B images
    x = x_nchw.reshape(n, 28, 28)
    # One-time host-side prep: pad batch to a multiple of B, zero-pad height
    # to 30 rows, and re-layout each block h-major (row = h*B + b).
    x = jnp.pad(x, ((0, g * _B - n), (1, 1), (0, 0)))
    x_hm = x.reshape(g, _B, 30, 28).transpose(0, 2, 1, 3).reshape(g * 30 * _B, 28)
    out = _fused_forward(x_hm, g, kparams)            # (g*B, 128)
    return out[:n, :10]                               # drop batch + class pad


# ----------------------------------------------------------------------------
# Pure-JAX reference (correctness check only)
# ----------------------------------------------------------------------------
def cnn_reference(x, params):
    w1, b1, w2, b2, wf, bf = params
    dn = ("NCHW", "HWIO", "NCHW")
    y = lax.conv_general_dilated(x, w1, (1, 1), ((1, 1), (1, 1)),
                                 dimension_numbers=dn)
    y = jnp.maximum(y + b1.reshape(1, -1, 1, 1), 0.0)
    y = lax.reduce_window(y, -jnp.inf, lax.max, (1, 1, 2, 2), (1, 1, 2, 2), "VALID")
    y = lax.conv_general_dilated(y, w2, (1, 1), ((1, 1), (1, 1)),
                                 dimension_numbers=dn)
    y = jnp.maximum(y + b2.reshape(1, -1, 1, 1), 0.0)
    y = lax.reduce_window(y, -jnp.inf, lax.max, (1, 1, 2, 2), (1, 1, 2, 2), "VALID")
    y = y.reshape(y.shape[0], -1)
    return y @ wf + bf


def init_params(key):
    k1, k2, k3, k4, k5, k6 = jax.random.split(key, 6)
    s1 = 1.0 / np.sqrt(1 * 3 * 3)
    s2 = 1.0 / np.sqrt(8 * 3 * 3)
    sf = 1.0 / np.sqrt(16 * 7 * 7)
    w1 = jax.random.uniform(k1, (3, 3, 1, 8), jnp.float32, -s1, s1)    # HWIO
    b1 = jax.random.uniform(k2, (8,), jnp.float32, -s1, s1)
    w2 = jax.random.uniform(k3, (3, 3, 8, 16), jnp.float32, -s2, s2)   # HWIO
    b2 = jax.random.uniform(k4, (16,), jnp.float32, -s2, s2)
    wf = jax.random.uniform(k5, (16 * 7 * 7, 10), jnp.float32, -sf, sf)
    bf = jax.random.uniform(k6, (10,), jnp.float32, -sf, sf)
    return (w1, b1, w2, b2, wf, bf)


if __name__ == "__main__":
    key = jax.random.PRNGKey(0)
    kx, kp = jax.random.split(key)
    params = init_params(kp)
    kparams = prepare_kernel_params(params)      # one-time weight re-layout

    # Spatial size 28 is implied by fc1 = Linear(16*7*7, 10); small batch of 2.
    x = jax.random.uniform(kx, (2, 1, 28, 28), jnp.float32)

    out = jax.block_until_ready(cnn_forward(x, kparams))
    assert out.shape == (2, 10), out.shape

    ref = jax.block_until_ready(cnn_reference(x, params))
    # Tolerance covers single-pass bf16 matmul operands in the kernel vs the
    # f32/default-precision XLA reference; the conv/pool/fc decomposition
    # itself is mathematically exact.
    np.testing.assert_allclose(np.asarray(out), np.asarray(ref),
                               rtol=3e-2, atol=3e-2)
    print("KERNEL_OK")
</pallas_src>

<mosaic_0001>
module attributes {stable_mosaic.version = 11 : i64} {
  func.func @_fused_cnn_kernel(%arg0: i32, %arg1: memref<240x28xf32, #tpu.memory_space<vmem>>, %arg2: memref<3x28x256xbf16, #tpu.memory_space<vmem>>, %arg3: memref<1x256xf32, #tpu.memory_space<vmem>>, %arg4: memref<3x128x256xbf16, #tpu.memory_space<vmem>>, %arg5: memref<1x256xf32, #tpu.memory_space<vmem>>, %arg6: memref<7x128x128xbf16, #tpu.memory_space<vmem>>, %arg7: memref<1x128xf32, #tpu.memory_space<vmem>>, %arg8: memref<8x128xf32, #tpu.memory_space<vmem>>, %arg9: memref<224x256xf32, #tpu.memory_space<vmem>>, %arg10: memref<112x256xf32, #tpu.memory_space<vmem>>, %arg11: memref<128x128xf32, #tpu.memory_space<vmem>>) attributes {dimension_semantics = [#tpu.dimension_semantics<parallel>], iteration_bounds = array<i64: 1>, scalar_prefetch = 0 : i64, scratch_operands = 3 : i64, tpu.core_type = #tpu.core_type<tc>, window_params = [{transform_indices = @transform_0, window_bounds = array<i64: 240, 28>}, {pipeline_mode = #tpu.pipeline_mode<synchronous>, transform_indices = @transform_1, window_bounds = array<i64: 3, 28, 256>}, {pipeline_mode = #tpu.pipeline_mode<synchronous>, transform_indices = @transform_2, window_bounds = array<i64: 1, 256>}, {pipeline_mode = #tpu.pipeline_mode<synchronous>, transform_indices = @transform_3, window_bounds = array<i64: 3, 128, 256>}, {pipeline_mode = #tpu.pipeline_mode<synchronous>, transform_indices = @transform_4, window_bounds = array<i64: 1, 256>}, {pipeline_mode = #tpu.pipeline_mode<synchronous>, transform_indices = @transform_5, window_bounds = array<i64: 7, 128, 128>}, {pipeline_mode = #tpu.pipeline_mode<synchronous>, transform_indices = @transform_6, window_bounds = array<i64: 1, 128>}, {transform_indices = @transform_7, window_bounds = array<i64: 8, 128>}]} {
    %c0 = arith.constant 0 : index
    %c0_0 = arith.constant 0 : index
    %0 = vector.load %arg1[%c0, %c0_0] : memref<240x28xf32, #tpu.memory_space<vmem>>, vector<224x28xf32>
    %1 = arith.truncf %0 : vector<224x28xf32> to vector<224x28xbf16>
    %c0_1 = arith.constant 0 : index
    %c0_2 = arith.constant 0 : index
    %c0_3 = arith.constant 0 : index
    %2 = vector.load %arg2[%c0_1, %c0_2, %c0_3] : memref<3x28x256xbf16, #tpu.memory_space<vmem>>, vector<1x28x256xbf16>
    %3 = vector.shape_cast %2 : vector<1x28x256xbf16> to vector<28x256xbf16>
    %cst = arith.constant dense<0.000000e+00> : vector<224x256xf32>
    %4 = tpu.matmul %1, %3, %cst {dimension_numbers = #tpu.dot_dimension_numbers<[1], [0], [0], [1], [0, 0, 1, 1], [], []>} : vector<224x28xbf16>, vector<28x256xbf16>, vector<224x256xf32> -> vector<224x256xf32>
    %c8 = arith.constant 8 : index
    %c0_4 = arith.constant 0 : index
    %5 = vector.load %arg1[%c8, %c0_4] : memref<240x28xf32, #tpu.memory_space<vmem>>, vector<224x28xf32>
    %6 = arith.truncf %5 : vector<224x28xf32> to vector<224x28xbf16>
    %c1 = arith.constant 1 : index
    %c0_5 = arith.constant 0 : index
    %c0_6 = arith.constant 0 : index
    %7 = vector.load %arg2[%c1, %c0_5, %c0_6] : memref<3x28x256xbf16, #tpu.memory_space<vmem>>, vector<1x28x256xbf16>
    %8 = vector.shape_cast %7 : vector<1x28x256xbf16> to vector<28x256xbf16>
    %cst_7 = arith.constant dense<0.000000e+00> : vector<224x256xf32>
    %9 = tpu.matmul %6, %8, %cst_7 {dimension_numbers = #tpu.dot_dimension_numbers<[1], [0], [0], [1], [0, 0, 1, 1], [], []>} : vector<224x28xbf16>, vector<28x256xbf16>, vector<224x256xf32> -> vector<224x256xf32>
    %10 = arith.addf %4, %9 : vector<224x256xf32>
    %c16 = arith.constant 16 : index
    %c0_8 = arith.constant 0 : index
    %11 = vector.load %arg1[%c16, %c0_8] : memref<240x28xf32, #tpu.memory_space<vmem>>, vector<224x28xf32>
    %12 = arith.truncf %11 : vector<224x28xf32> to vector<224x28xbf16>
    %c2 = arith.constant 2 : index
    %c0_9 = arith.constant 0 : index
    %c0_10 = arith.constant 0 : index
    %13 = vector.load %arg2[%c2, %c0_9, %c0_10] : memref<3x28x256xbf16, #tpu.memory_space<vmem>>, vector<1x28x256xbf16>
    %14 = vector.shape_cast %13 : vector<1x28x256xbf16> to vector<28x256xbf16>
    %cst_11 = arith.constant dense<0.000000e+00> : vector<224x256xf32>
    %15 = tpu.matmul %12, %14, %cst_11 {dimension_numbers = #tpu.dot_dimension_numbers<[1], [0], [0], [1], [0, 0, 1, 1], [], []>} : vector<224x28xbf16>, vector<28x256xbf16>, vector<224x256xf32> -> vector<224x256xf32>
    %16 = arith.addf %10, %15 : vector<224x256xf32>
    %c0_12 = arith.constant 0 : index
    %c0_13 = arith.constant 0 : index
    %17 = vector.load %arg3[%c0_12, %c0_13] : memref<1x256xf32, #tpu.memory_space<vmem>>, vector<1x256xf32>
    %18 = vector.broadcast %17 : vector<1x256xf32> to vector<224x256xf32>
    %19 = arith.addf %16, %18 : vector<224x256xf32>
    %cst_14 = arith.constant 0.000000e+00 : f32
    %20 = vector.broadcast %cst_14 : f32 to vector<224x256xf32>
    %21 = arith.maximumf %19, %20 : vector<224x256xf32>
    %c0_15 = arith.constant 0 : index
    %c0_16 = arith.constant 0 : index
    %22 = vector.load %arg9[%c0_15, %c0_16] : memref<224x256xf32, #tpu.memory_space<vmem>>, vector<224x256xf32>
    tpu.vector_store %arg9[%c0_15, %c0_16], %21 {strides = array<i32>} : memref<224x256xf32, #tpu.memory_space<vmem>>, vector<224x256xf32>,
    %cst_17 = arith.constant 0.000000e+00 : f32
    %23 = vector.broadcast %cst_17 : f32 to vector<8x128xf32>
    %c0_18 = arith.constant 0 : index
    %c0_19 = arith.constant 0 : index
    %24 = vector.load %arg11[%c0_18, %c0_19] : memref<128x128xf32, #tpu.memory_space<vmem>>, vector<8x128xf32>
    tpu.vector_store %arg11[%c0_18, %c0_19], %23 {strides = array<i32>} : memref<128x128xf32, #tpu.memory_space<vmem>>, vector<8x128xf32>,
    %cst_20 = arith.constant 0.000000e+00 : f32
    %25 = vector.broadcast %cst_20 : f32 to vector<8x128xf32>
    %c120 = arith.constant 120 : index
    %c0_21 = arith.constant 0 : index
    %26 = vector.load %arg11[%c120, %c0_21] : memref<128x128xf32, #tpu.memory_space<vmem>>, vector<8x128xf32>
    tpu.vector_store %arg11[%c120, %c0_21], %25 {strides = array<i32>} : memref<128x128xf32, #tpu.memory_space<vmem>>, vector<8x128xf32>,
    %c0_22 = arith.constant 0 : index
    %c0_23 = arith.constant 0 : index
    %27 = vector.load %arg9[%c0_22, %c0_23] : memref<224x256xf32, #tpu.memory_space<vmem>>, vector<8x256xf32>
    %c8_24 = arith.constant 8 : index
    %c0_25 = arith.constant 0 : index
    %28 = vector.load %arg9[%c8_24, %c0_25] : memref<224x256xf32, #tpu.memory_space<vmem>>, vector<8x256xf32>
    %29 = arith.maximumf %27, %28 : vector<8x256xf32>
    %30 = vector.extract_strided_slice %29 {offsets = [0, 0], sizes = [8, 128], strides = [1, 1]} : vector<8x256xf32> to vector<8x128xf32>
    %31 = vector.extract_strided_slice %29 {offsets = [0, 128], sizes = [8, 128], strides = [1, 1]} : vector<8x256xf32> to vector<8x128xf32>
    %32 = arith.maximumf %30, %31 : vector<8x128xf32>
    %c8_26 = arith.constant 8 : index
    %c0_27 = arith.constant 0 : index
    %33 = vector.load %arg11[%c8_26, %c0_27] : memref<128x128xf32, #tpu.memory_space<vmem>>, vector<8x128xf32>
    tpu.vector_store %arg11[%c8_26, %c0_27], %32 {strides = array<i32>} : memref<128x128xf32, #tpu.memory_space<vmem>>, vector<8x128xf32>,
    %c16_28 = arith.constant 16 : index
    %c0_29 = arith.constant 0 : index
    %34 = vector.load %arg9[%c16_28, %c0_29] : memref<224x256xf32, #tpu.memory_space<vmem>>, vector<8x256xf32>
    %c24 = arith.constant 24 : index
    %c0_30 = arith.constant 0 : index
    %35 = vector.load %arg9[%c24, %c0_30] : memref<224x256xf32, #tpu.memory_space<vmem>>, vector<8x256xf32>
    %36 = arith.maximumf %34, %35 : vector<8x256xf32>
    %37 = vector.extract_strided_slice %36 {offsets = [0, 0], sizes = [8, 128], strides = [1, 1]} : vector<8x256xf32> to vector<8x128xf32>
    %38 = vector.extract_strided_slice %36 {offsets = [0, 128], sizes = [8, 128], strides = [1, 1]} : vector<8x256xf32> to vector<8x128xf32>
    %39 = arith.maximumf %37, %38 : vector<8x128xf32>
    %c16_31 = arith.constant 16 : index
    %c0_32 = arith.constant 0 : index
    %40 = vector.load %arg11[%c16_31, %c0_32] : memref<128x128xf32, #tpu.memory_space<vmem>>, vector<8x128xf32>
    tpu.vector_store %arg11[%c16_31, %c0_32], %39 {strides = array<i32>} : memref<128x128xf32, #tpu.memory_space<vmem>>, vector<8x128xf32>,
    %c32 = arith.constant 32 : index
    %c0_33 = arith.constant 0 : index
    %41 = vector.load %arg9[%c32, %c0_33] : memref<224x256xf32, #tpu.memory_space<vmem>>, vector<8x256xf32>
    %c40 = arith.constant 40 : index
    %c0_34 = arith.constant 0 : index
    %42 = vector.load %arg9[%c40, %c0_34] : memref<224x256xf32, #tpu.memory_space<vmem>>, vector<8x256xf32>
    %43 = arith.maximumf %41, %42 : vector<8x256xf32>
    %44 = vector.extract_strided_slice %43 {offsets = [0, 0], sizes = [8, 128], strides = [1, 1]} : vector<8x256xf32> to vector<8x128xf32>
    %45 = vector.extract_strided_slice %43 {offsets = [0, 128], sizes = [8, 128], strides = [1, 1]} : vector<8x256xf32> to vector<8x128xf32>
    %46 = arith.maximumf %44, %45 : vector<8x128xf32>
    %c24_35 = arith.constant 24 : index
    %c0_36 = arith.constant 0 : index
    %47 = vector.load %arg11[%c24_35, %c0_36] : memref<128x128xf32, #tpu.memory_space<vmem>>, vector<8x128xf32>
    tpu.vector_store %arg11[%c24_35, %c0_36], %46 {strides = array<i32>} : memref<128x128xf32, #tpu.memory_space<vmem>>, vector<8x128xf32>,
    %c48 = arith.constant 48 : index
    %c0_37 = arith.constant 0 : index
    %48 = vector.load %arg9[%c48, %c0_37] : memref<224x256xf32, #tpu.memory_space<vmem>>, vector<8x256xf32>
    %c56 = arith.constant 56 : index
    %c0_38 = arith.constant 0 : index
    %49 = vector.load %arg9[%c56, %c0_38] : memref<224x256xf32, #tpu.memory_space<vmem>>, vector<8x256xf32>
    %50 = arith.maximumf %48, %49 : vector<8x256xf32>
    %51 = vector.extract_strided_slice %50 {offsets = [0, 0], sizes = [8, 128], strides = [1, 1]} : vector<8x256xf32> to vector<8x128xf32>
    %52 = vector.extract_strided_slice %50 {offsets = [0, 128], sizes = [8, 128], strides = [1, 1]} : vector<8x256xf32> to vector<8x128xf32>
    %53 = arith.maximumf %51, %52 : vector<8x128xf32>
    %c32_39 = arith.constant 32 : index
    %c0_40 = arith.constant 0 : index
    %54 = vector.load %arg11[%c32_39, %c0_40] : memref<128x128xf32, #tpu.memory_space<vmem>>, vector<8x128xf32>
    tpu.vector_store %arg11[%c32_39, %c0_40], %53 {strides = array<i32>} : memref<128x128xf32, #tpu.memory_space<vmem>>, vector<8x128xf32>,
    %c64 = arith.constant 64 : index
    %c0_41 = arith.constant 0 : index
    %55 = vector.load %arg9[%c64, %c0_41] : memref<224x256xf32, #tpu.memory_space<vmem>>, vector<8x256xf32>
    %c72 = arith.constant 72 : index
    %c0_42 = arith.constant 0 : index
    %56 = vector.load %arg9[%c72, %c0_42] : memref<224x256xf32, #tpu.memory_space<vmem>>, vector<8x256xf32>
    %57 = arith.maximumf %55, %56 : vector<8x256xf32>
    %58 = vector.extract_strided_slice %57 {offsets = [0, 0], sizes = [8, 128], strides = [1, 1]} : vector<8x256xf32> to vector<8x128xf32>
    %59 = vector.extract_strided_slice %57 {offsets = [0, 128], sizes = [8, 128], strides = [1, 1]} : vector<8x256xf32> to vector<8x128xf32>
    %60 = arith.maximumf %58, %59 : vector<8x128xf32>
    %c40_43 = arith.constant 40 : index
    %c0_44 = arith.constant 0 : index
    %61 = vector.load %arg11[%c40_43, %c0_44] : memref<128x128xf32, #tpu.memory_space<vmem>>, vector<8x128xf32>
    tpu.vector_store %arg11[%c40_43, %c0_44], %60 {strides = array<i32>} : memref<128x128xf32, #tpu.memory_space<vmem>>, vector<8x128xf32>,
    %c80 = arith.constant 80 : index
    %c0_45 = arith.constant 0 : index
    %62 = vector.load %arg9[%c80, %c0_45] : memref<224x256xf32, #tpu.memory_space<vmem>>, vector<8x256xf32>
    %c88 = arith.constant 88 : index
    %c0_46 = arith.constant 0 : index
    %63 = vector.load %arg9[%c88, %c0_46] : memref<224x256xf32, #tpu.memory_space<vmem>>, vector<8x256xf32>
    %64 = arith.maximumf %62, %63 : vector<8x256xf32>
    %65 = vector.extract_strided_slice %64 {offsets = [0, 0], sizes = [8, 128], strides = [1, 1]} : vector<8x256xf32> to vector<8x128xf32>
    %66 = vector.extract_strided_slice %64 {offsets = [0, 128], sizes = [8, 128], strides = [1, 1]} : vector<8x256xf32> to vector<8x128xf32>
    %67 = arith.maximumf %65, %66 : vector<8x128xf32>
    %c48_47 = arith.constant 48 : index
    %c0_48 = arith.constant 0 : index
    %68 = vector.load %arg11[%c48_47, %c0_48] : memref<128x128xf32, #tpu.memory_space<vmem>>, vector<8x128xf32>
    tpu.vector_store %arg11[%c48_47, %c0_48], %67 {strides = array<i32>} : memref<128x128xf32, #tpu.memory_space<vmem>>, vector<8x128xf32>,
    %c96 = arith.constant 96 : index
    %c0_49 = arith.constant 0 : index
    %69 = vector.load %arg9[%c96, %c0_49] : memref<224x256xf32, #tpu.memory_space<vmem>>, vector<8x256xf32>
    %c104 = arith.constant 104 : index
    %c0_50 = arith.constant 0 : index
    %70 = vector.load %arg9[%c104, %c0_50] : memref<224x256xf32, #tpu.memory_space<vmem>>, vector<8x256xf32>
    %71 = arith.maximumf %69, %70 : vector<8x256xf32>
    %72 = vector.extract_strided_slice %71 {offsets = [0, 0], sizes = [8, 128], strides = [1, 1]} : vector<8x256xf32> to vector<8x128xf32>
    %73 = vector.extract_strided_slice %71 {offsets = [0, 128], sizes = [8, 128], strides = [1, 1]} : vector<8x256xf32> to vector<8x128xf32>
    %74 = arith.maximumf %72, %73 : vector<8x128xf32>
    %c56_51 = arith.constant 56 : index
    %c0_52 = arith.constant 0 : index
    %75 = vector.load %arg11[%c56_51, %c0_52] : memref<128x128xf32, #tpu.memory_space<vmem>>, vector<8x128xf32>
    tpu.vector_store %arg11[%c56_51, %c0_52], %74 {strides = array<i32>} : memref<128x128xf32, #tpu.memory_space<vmem>>, vector<8x128xf32>,
    %c112 = arith.constant 112 : index
    %c0_53 = arith.constant 0 : index
    %76 = vector.load %arg9[%c112, %c0_53] : memref<224x256xf32, #tpu.memory_space<vmem>>, vector<8x256xf32>
    %c120_54 = arith.constant 120 : index
    %c0_55 = arith.constant 0 : index
    %77 = vector.load %arg9[%c120_54, %c0_55] : memref<224x256xf32, #tpu.memory_space<vmem>>, vector<8x256xf32>
    %78 = arith.maximumf %76, %77 : vector<8x256xf32>
    %79 = vector.extract_strided_slice %78 {offsets = [0, 0], sizes = [8, 128], strides = [1, 1]} : vector<8x256xf32> to vector<8x128xf32>
    %80 = vector.extract_strided_slice %78 {offsets = [0, 128], sizes = [8, 128], strides = [1, 1]} : vector<8x256xf32> to vector<8x128xf32>
    %81 = arith.maximumf %79, %80 : vector<8x128xf32>
    %c64_56 = arith.constant 64 : index
    %c0_57 = arith.constant 0 : index
    %82 = vector.load %arg11[%c64_56, %c0_57] : memref<128x128xf32, #tpu.memory_space<vmem>>, vector<8x128xf32>
    tpu.vector_store %arg11[%c64_56, %c0_57], %81 {strides = array<i32>} : memref<128x128xf32, #tpu.memory_space<vmem>>, vector<8x128xf32>,
    %c128 = arith.constant 128 : index
    %c0_58 = arith.constant 0 : index
    %83 = vector.load %arg9[%c128, %c0_58] : memref<224x256xf32, #tpu.memory_space<vmem>>, vector<8x256xf32>
    %c136 = arith.constant 136 : index
    %c0_59 = arith.constant 0 : index
    %84 = vector.load %arg9[%c136, %c0_59] : memref<224x256xf32, #tpu.memory_space<vmem>>, vector<8x256xf32>
    %85 = arith.maximumf %83, %84 : vector<8x256xf32>
    %86 = vector.extract_strided_slice %85 {offsets = [0, 0], sizes = [8, 128], strides = [1, 1]} : vector<8x256xf32> to vector<8x128xf32>
    %87 = vector.extract_strided_slice %85 {offsets = [0, 128], sizes = [8, 128], strides = [1, 1]} : vector<8x256xf32> to vector<8x128xf32>
    %88 = arith.maximumf %86, %87 : vector<8x128xf32>
    %c72_60 = arith.constant 72 : index
    %c0_61 = arith.constant 0 : index
    %89 = vector.load %arg11[%c72_60, %c0_61] : memref<128x128xf32, #tpu.memory_space<vmem>>, vector<8x128xf32>
    tpu.vector_store %arg11[%c72_60, %c0_61], %88 {strides = array<i32>} : memref<128x128xf32, #tpu.memory_space<vmem>>, vector<8x128xf32>,
    %c144 = arith.constant 144 : index
    %c0_62 = arith.constant 0 : index
    %90 = vector.load %arg9[%c144, %c0_62] : memref<224x256xf32, #tpu.memory_space<vmem>>, vector<8x256xf32>
    %c152 = arith.constant 152 : index
    %c0_63 = arith.constant 0 : index
    %91 = vector.load %arg9[%c152, %c0_63] : memref<224x256xf32, #tpu.memory_space<vmem>>, vector<8x256xf32>
    %92 = arith.maximumf %90, %91 : vector<8x256xf32>
    %93 = vector.extract_strided_slice %92 {offsets = [0, 0], sizes = [8, 128], strides = [1, 1]} : vector<8x256xf32> to vector<8x128xf32>
    %94 = vector.extract_strided_slice %92 {offsets = [0, 128], sizes = [8, 128], strides = [1, 1]} : vector<8x256xf32> to vector<8x128xf32>
    %95 = arith.maximumf %93, %94 : vector<8x128xf32>
    %c80_64 = arith.constant 80 : index
    %c0_65 = arith.constant 0 : index
    %96 = vector.load %arg11[%c80_64, %c0_65] : memref<128x128xf32, #tpu.memory_space<vmem>>, vector<8x128xf32>
    tpu.vector_store %arg11[%c80_64, %c0_65], %95 {strides = array<i32>} : memref<128x128xf32, #tpu.memory_space<vmem>>, vector<8x128xf32>,
    %c160 = arith.constant 160 : index
    %c0_66 = arith.constant 0 : index
    %97 = vector.load %arg9[%c160, %c0_66] : memref<224x256xf32, #tpu.memory_space<vmem>>, vector<8x256xf32>
    %c168 = arith.constant 168 : index
    %c0_67 = arith.constant 0 : index
    %98 = vector.load %arg9[%c168, %c0_67] : memref<224x256xf32, #tpu.memory_space<vmem>>, vector<8x256xf32>
    %99 = arith.maximumf %97, %98 : vector<8x256xf32>
    %100 = vector.extract_strided_slice %99 {offsets = [0, 0], sizes = [8, 128], strides = [1, 1]} : vector<8x256xf32> to vector<8x128xf32>
    %101 = vector.extract_strided_slice %99 {offsets = [0, 128], sizes = [8, 128], strides = [1, 1]} : vector<8x256xf32> to vector<8x128xf32>
    %102 = arith.maximumf %100, %101 : vector<8x128xf32>
    %c88_68 = arith.constant 88 : index
    %c0_69 = arith.constant 0 : index
    %103 = vector.load %arg11[%c88_68, %c0_69] : memref<128x128xf32, #tpu.memory_space<vmem>>, vector<8x128xf32>
    tpu.vector_store %arg11[%c88_68, %c0_69], %102 {strides = array<i32>} : memref<128x128xf32, #tpu.memory_space<vmem>>, vector<8x128xf32>,
    %c176 = arith.constant 176 : index
    %c0_70 = arith.constant 0 : index
    %104 = vector.load %arg9[%c176, %c0_70] : memref<224x256xf32, #tpu.memory_space<vmem>>, vector<8x256xf32>
    %c184 = arith.constant 184 : index
    %c0_71 = arith.constant 0 : index
    %105 = vector.load %arg9[%c184, %c0_71] : memref<224x256xf32, #tpu.memory_space<vmem>>, vector<8x256xf32>
    %106 = arith.maximumf %104, %105 : vector<8x256xf32>
    %107 = vector.extract_strided_slice %106 {offsets = [0, 0], sizes = [8, 128], strides = [1, 1]} : vector<8x256xf32> to vector<8x128xf32>
    %108 = vector.extract_strided_slice %106 {offsets = [0, 128], sizes = [8, 128], strides = [1, 1]} : vector<8x256xf32> to vector<8x128xf32>
    %109 = arith.maximumf %107, %108 : vector<8x128xf32>
    %c96_72 = arith.constant 96 : index
    %c0_73 = arith.constant 0 : index
    %110 = vector.load %arg11[%c96_72, %c0_73] : memref<128x128xf32, #tpu.memory_space<vmem>>, vector<8x128xf32>
    tpu.vector_store %arg11[%c96_72, %c0_73], %109 {strides = array<i32>} : memref<128x128xf32, #tpu.memory_space<vmem>>, vector<8x128xf32>,
    %c192 = arith.constant 192 : index
    %c0_74 = arith.constant 0 : index
    %111 = vector.load %arg9[%c192, %c0_74] : memref<224x256xf32, #tpu.memory_space<vmem>>, vector<8x256xf32>
    %c200 = arith.constant 200 : index
    %c0_75 = arith.constant 0 : index
    %112 = vector.load %arg9[%c200, %c0_75] : memref<224x256xf32, #tpu.memory_space<vmem>>, vector<8x256xf32>
    %113 = arith.maximumf %111, %112 : vector<8x256xf32>
    %114 = vector.extract_strided_slice %113 {offsets = [0, 0], sizes = [8, 128], strides = [1, 1]} : vector<8x256xf32> to vector<8x128xf32>
    %115 = vector.extract_strided_slice %113 {offsets = [0, 128], sizes = [8, 128], strides = [1, 1]} : vector<8x256xf32> to vector<8x128xf32>
    %116 = arith.maximumf %114, %115 : vector<8x128xf32>
    %c104_76 = arith.constant 104 : index
    %c0_77 = arith.constant 0 : index
    %117 = vector.load %arg11[%c104_76, %c0_77] : memref<128x128xf32, #tpu.memory_space<vmem>>, vector<8x128xf32>
    tpu.vector_store %arg11[%c104_76, %c0_77], %116 {strides = array<i32>} : memref<128x128xf32, #tpu.memory_space<vmem>>, vector<8x128xf32>,
    %c208 = arith.constant 208 : index
    %c0_78 = arith.constant 0 : index
    %118 = vector.load %arg9[%c208, %c0_78] : memref<224x256xf32, #tpu.memory_space<vmem>>, vector<8x256xf32>
    %c216 = arith.constant 216 : index
    %c0_79 = arith.constant 0 : index
    %119 = vector.load %arg9[%c216, %c0_79] : memref<224x256xf32, #tpu.memory_space<vmem>>, vector<8x256xf32>
    %120 = arith.maximumf %118, %119 : vector<8x256xf32>
    %121 = vector.extract_strided_slice %120 {offsets = [0, 0], sizes = [8, 128], strides = [1, 1]} : vector<8x256xf32> to vector<8x128xf32>
    %122 = vector.extract_strided_slice %120 {offsets = [0, 128], sizes = [8, 128], strides = [1, 1]} : vector<8x256xf32> to vector<8x128xf32>
    %123 = arith.maximumf %121, %122 : vector<8x128xf32>
    %c112_80 = arith.constant 112 : index
    %c0_81 = arith.constant 0 : index
    %124 = vector.load %arg11[%c112_80, %c0_81] : memref<128x128xf32, #tpu.memory_space<vmem>>, vector<8x128xf32>
    tpu.vector_store %arg11[%c112_80, %c0_81], %123 {strides = array<i32>} : memref<128x128xf32, #tpu.memory_space<vmem>>, vector<8x128xf32>,
    %c0_82 = arith.constant 0 : index
    %c0_83 = arith.constant 0 : index
    %125 = vector.load %arg11[%c0_82, %c0_83] : memref<128x128xf32, #tpu.memory_space<vmem>>, vector<112x128xf32>
    %126 = arith.truncf %125 : vector<112x128xf32> to vector<112x128xbf16>
    %c0_84 = arith.constant 0 : index
    %c0_85 = arith.constant 0 : index
    %c0_86 = arith.constant 0 : index
    %127 = vector.load %arg4[%c0_84, %c0_85, %c0_86] : memref<3x128x256xbf16, #tpu.memory_space<vmem>>, vector<1x128x256xbf16>
    %128 = vector.shape_cast %127 : vector<1x128x256xbf16> to vector<128x256xbf16>
    %cst_87 = arith.constant dense<0.000000e+00> : vector<112x256xf32>
    %129 = tpu.matmul %126, %128, %cst_87 {dimension_numbers = #tpu.dot_dimension_numbers<[1], [0], [0], [1], [0, 0, 1, 1], [], []>} : vector<112x128xbf16>, vector<128x256xbf16>, vector<112x256xf32> -> vector<112x256xf32>
    %c8_88 = arith.constant 8 : index
    %c0_89 = arith.constant 0 : index
    %130 = vector.load %arg11[%c8_88, %c0_89] : memref<128x128xf32, #tpu.memory_space<vmem>>, vector<112x128xf32>
    %131 = arith.truncf %130 : vector<112x128xf32> to vector<112x128xbf16>
    %c1_90 = arith.constant 1 : index
    %c0_91 = arith.constant 0 : index
    %c0_92 = arith.constant 0 : index
    %132 = vector.load %arg4[%c1_90, %c0_91, %c0_92] : memref<3x128x256xbf16, #tpu.memory_space<vmem>>, vector<1x128x256xbf16>
    %133 = vector.shape_cast %132 : vector<1x128x256xbf16> to vector<128x256xbf16>
    %cst_93 = arith.constant dense<0.000000e+00> : vector<112x256xf32>
    %134 = tpu.matmul %131, %133, %cst_93 {dimension_numbers = #tpu.dot_dimension_numbers<[1], [0], [0], [1], [0, 0, 1, 1], [], []>} : vector<112x128xbf16>, vector<128x256xbf16>, vector<112x256xf32> -> vector<112x256xf32>
    %135 = arith.addf %129, %134 : vector<112x256xf32>
    %c16_94 = arith.constant 16 : index
    %c0_95 = arith.constant 0 : index
    %136 = vector.load %arg11[%c16_94, %c0_95] : memref<128x128xf32, #tpu.memory_space<vmem>>, vector<112x128xf32>
    %137 = arith.truncf %136 : vector<112x128xf32> to vector<112x128xbf16>
    %c2_96 = arith.constant 2 : index
    %c0_97 = arith.constant 0 : index
    %c0_98 = arith.constant 0 : index
    %138 = vector.load %arg4[%c2_96, %c0_97, %c0_98] : memref<3x128x256xbf16, #tpu.memory_space<vmem>>, vector<1x128x256xbf16>
    %139 = vector.shape_cast %138 : vector<1x128x256xbf16> to vector<128x256xbf16>
    %cst_99 = arith.constant dense<0.000000e+00> : vector<112x256xf32>
    %140 = tpu.matmul %137, %139, %cst_99 {dimension_numbers = #tpu.dot_dimension_numbers<[1], [0], [0], [1], [0, 0, 1, 1], [], []>} : vector<112x128xbf16>, vector<128x256xbf16>, vector<112x256xf32> -> vector<112x256xf32>
    %141 = arith.addf %135, %140 : vector<112x256xf32>
    %c0_100 = arith.constant 0 : index
    %c0_101 = arith.constant 0 : index
    %142 = vector.load %arg5[%c0_100, %c0_101] : memref<1x256xf32, #tpu.memory_space<vmem>>, vector<1x256xf32>
    %143 = vector.broadcast %142 : vector<1x256xf32> to vector<112x256xf32>
    %144 = arith.addf %141, %143 : vector<112x256xf32>
    %cst_102 = arith.constant 0.000000e+00 : f32
    %145 = vector.broadcast %cst_102 : f32 to vector<112x256xf32>
    %146 = arith.maximumf %144, %145 : vector<112x256xf32>
    %c0_103 = arith.constant 0 : index
    %c0_104 = arith.constant 0 : index
    %147 = vector.load %arg10[%c0_103, %c0_104] : memref<112x256xf32, #tpu.memory_space<vmem>>, vector<112x256xf32>
    tpu.vector_store %arg10[%c0_103, %c0_104], %146 {strides = array<i32>} : memref<112x256xf32, #tpu.memory_space<vmem>>, vector<112x256xf32>,
    %cst_105 = arith.constant 0.000000e+00 : f32
    %148 = vector.broadcast %cst_105 : f32 to vector<8x128xf32>
    %c0_106 = arith.constant 0 : index
    %c0_107 = arith.constant 0 : index
    %149 = vector.load %arg10[%c0_106, %c0_107] : memref<112x256xf32, #tpu.memory_space<vmem>>, vector<8x256xf32>
    %c8_108 = arith.constant 8 : index
    %c0_109 = arith.constant 0 : index
    %150 = vector.load %arg10[%c8_108, %c0_109] : memref<112x256xf32, #tpu.memory_space<vmem>>, vector<8x256xf32>
    %151 = arith.maximumf %149, %150 : vector<8x256xf32>
    %152 = vector.extract_strided_slice %151 {offsets = [0, 0], sizes = [8, 128], strides = [1, 1]} : vector<8x256xf32> to vector<8x128xf32>
    %153 = vector.extract_strided_slice %151 {offsets = [0, 128], sizes = [8, 128], strides = [1, 1]} : vector<8x256xf32> to vector<8x128xf32>
    %154 = arith.maximumf %152, %153 : vector<8x128xf32>
    %155 = arith.truncf %154 : vector<8x128xf32> to vector<8x128xbf16>
    %c0_110 = arith.constant 0 : index
    %c0_111 = arith.constant 0 : index
    %c0_112 = arith.constant 0 : index
    %156 = vector.load %arg6[%c0_110, %c0_111, %c0_112] : memref<7x128x128xbf16, #tpu.memory_space<vmem>>, vector<1x128x128xbf16>
    %157 = vector.shape_cast %156 : vector<1x128x128xbf16> to vector<128x128xbf16>
    %cst_113 = arith.constant dense<0.000000e+00> : vector<8x128xf32>
    %158 = tpu.matmul %155, %157, %cst_113 {dimension_numbers = #tpu.dot_dimension_numbers<[1], [0], [0], [1], [0, 0, 1, 1], [], []>} : vector<8x128xbf16>, vector<128x128xbf16>, vector<8x128xf32> -> vector<8x128xf32>
    %159 = arith.addf %148, %158 : vector<8x128xf32>
    %c16_114 = arith.constant 16 : index
    %c0_115 = arith.constant 0 : index
    %160 = vector.load %arg10[%c16_114, %c0_115] : memref<112x256xf32, #tpu.memory_space<vmem>>, vector<8x256xf32>
    %c24_116 = arith.constant 24 : index
    %c0_117 = arith.constant 0 : index
    %161 = vector.load %arg10[%c24_116, %c0_117] : memref<112x256xf32, #tpu.memory_space<vmem>>, vector<8x256xf32>
    %162 = arith.maximumf %160, %161 : vector<8x256xf32>
    %163 = vector.extract_strided_slice %162 {offsets = [0, 0], sizes = [8, 128], strides = [1, 1]} : vector<8x256xf32> to vector<8x128xf32>
    %164 = vector.extract_strided_slice %162 {offsets = [0, 128], sizes = [8, 128], strides = [1, 1]} : vector<8x256xf32> to vector<8x128xf32>
    %165 = arith.maximumf %163, %164 : vector<8x128xf32>
    %166 = arith.truncf %165 : vector<8x128xf32> to vector<8x128xbf16>
    %c1_118 = arith.constant 1 : index
    %c0_119 = arith.constant 0 : index
    %c0_120 = arith.constant 0 : index
    %167 = vector.load %arg6[%c1_118, %c0_119, %c0_120] : memref<7x128x128xbf16, #tpu.memory_space<vmem>>, vector<1x128x128xbf16>
    %168 = vector.shape_cast %167 : vector<1x128x128xbf16> to vector<128x128xbf16>
    %cst_121 = arith.constant dense<0.000000e+00> : vector<8x128xf32>
    %169 = tpu.matmul %166, %168, %cst_121 {dimension_numbers = #tpu.dot_dimension_numbers<[1], [0], [0], [1], [0, 0, 1, 1], [], []>} : vector<8x128xbf16>, vector<128x128xbf16>, vector<8x128xf32> -> vector<8x128xf32>
    %170 = arith.addf %159, %169 : vector<8x128xf32>
    %c32_122 = arith.constant 32 : index
    %c0_123 = arith.constant 0 : index
    %171 = vector.load %arg10[%c32_122, %c0_123] : memref<112x256xf32, #tpu.memory_space<vmem>>, vector<8x256xf32>
    %c40_124 = arith.constant 40 : index
    %c0_125 = arith.constant 0 : index
    %172 = vector.load %arg10[%c40_124, %c0_125] : memref<112x256xf32, #tpu.memory_space<vmem>>, vector<8x256xf32>
    %173 = arith.maximumf %171, %172 : vector<8x256xf32>
    %174 = vector.extract_strided_slice %173 {offsets = [0, 0], sizes = [8, 128], strides = [1, 1]} : vector<8x256xf32> to vector<8x128xf32>
    %175 = vector.extract_strided_slice %173 {offsets = [0, 128], sizes = [8, 128], strides = [1, 1]} : vector<8x256xf32> to vector<8x128xf32>
    %176 = arith.maximumf %174, %175 : vector<8x128xf32>
    %177 = arith.truncf %176 : vector<8x128xf32> to vector<8x128xbf16>
    %c2_126 = arith.constant 2 : index
    %c0_127 = arith.constant 0 : index
    %c0_128 = arith.constant 0 : index
    %178 = vector.load %arg6[%c2_126, %c0_127, %c0_128] : memref<7x128x128xbf16, #tpu.memory_space<vmem>>, vector<1x128x128xbf16>
    %179 = vector.shape_cast %178 : vector<1x128x128xbf16> to vector<128x128xbf16>
    %cst_129 = arith.constant dense<0.000000e+00> : vector<8x128xf32>
    %180 = tpu.matmul %177, %179, %cst_129 {dimension_numbers = #tpu.dot_dimension_numbers<[1], [0], [0], [1], [0, 0, 1, 1], [], []>} : vector<8x128xbf16>, vector<128x128xbf16>, vector<8x128xf32> -> vector<8x128xf32>
    %181 = arith.addf %170, %180 : vector<8x128xf32>
    %c48_130 = arith.constant 48 : index
    %c0_131 = arith.constant 0 : index
    %182 = vector.load %arg10[%c48_130, %c0_131] : memref<112x256xf32, #tpu.memory_space<vmem>>, vector<8x256xf32>
    %c56_132 = arith.constant 56 : index
    %c0_133 = arith.constant 0 : index
    %183 = vector.load %arg10[%c56_132, %c0_133] : memref<112x256xf32, #tpu.memory_space<vmem>>, vector<8x256xf32>
    %184 = arith.maximumf %182, %183 : vector<8x256xf32>
    %185 = vector.extract_strided_slice %184 {offsets = [0, 0], sizes = [8, 128], strides = [1, 1]} : vector<8x256xf32> to vector<8x128xf32>
    %186 = vector.extract_strided_slice %184 {offsets = [0, 128], sizes = [8, 128], strides = [1, 1]} : vector<8x256xf32> to vector<8x128xf32>
    %187 = arith.maximumf %185, %186 : vector<8x128xf32>
    %188 = arith.truncf %187 : vector<8x128xf32> to vector<8x128xbf16>
    %c3 = arith.constant 3 : index
    %c0_134 = arith.constant 0 : index
    %c0_135 = arith.constant 0 : index
    %189 = vector.load %arg6[%c3, %c0_134, %c0_135] : memref<7x128x128xbf16, #tpu.memory_space<vmem>>, vector<1x128x128xbf16>
    %190 = vector.shape_cast %189 : vector<1x128x128xbf16> to vector<128x128xbf16>
    %cst_136 = arith.constant dense<0.000000e+00> : vector<8x128xf32>
    %191 = tpu.matmul %188, %190, %cst_136 {dimension_numbers = #tpu.dot_dimension_numbers<[1], [0], [0], [1], [0, 0, 1, 1], [], []>} : vector<8x128xbf16>, vector<128x128xbf16>, vector<8x128xf32> -> vector<8x128xf32>
    %192 = arith.addf %181, %191 : vector<8x128xf32>
    %c64_137 = arith.constant 64 : index
    %c0_138 = arith.constant 0 : index
    %193 = vector.load %arg10[%c64_137, %c0_138] : memref<112x256xf32, #tpu.memory_space<vmem>>, vector<8x256xf32>
    %c72_139 = arith.constant 72 : index
    %c0_140 = arith.constant 0 : index
    %194 = vector.load %arg10[%c72_139, %c0_140] : memref<112x256xf32, #tpu.memory_space<vmem>>, vector<8x256xf32>
    %195 = arith.maximumf %193, %194 : vector<8x256xf32>
    %196 = vector.extract_strided_slice %195 {offsets = [0, 0], sizes = [8, 128], strides = [1, 1]} : vector<8x256xf32> to vector<8x128xf32>
    %197 = vector.extract_strided_slice %195 {offsets = [0, 128], sizes = [8, 128], strides = [1, 1]} : vector<8x256xf32> to vector<8x128xf32>
    %198 = arith.maximumf %196, %197 : vector<8x128xf32>
    %199 = arith.truncf %198 : vector<8x128xf32> to vector<8x128xbf16>
    %c4 = arith.constant 4 : index
    %c0_141 = arith.constant 0 : index
    %c0_142 = arith.constant 0 : index
    %200 = vector.load %arg6[%c4, %c0_141, %c0_142] : memref<7x128x128xbf16, #tpu.memory_space<vmem>>, vector<1x128x128xbf16>
    %201 = vector.shape_cast %200 : vector<1x128x128xbf16> to vector<128x128xbf16>
    %cst_143 = arith.constant dense<0.000000e+00> : vector<8x128xf32>
    %202 = tpu.matmul %199, %201, %cst_143 {dimension_numbers = #tpu.dot_dimension_numbers<[1], [0], [0], [1], [0, 0, 1, 1], [], []>} : vector<8x128xbf16>, vector<128x128xbf16>, vector<8x128xf32> -> vector<8x128xf32>
    %203 = arith.addf %192, %202 : vector<8x128xf32>
    %c80_144 = arith.constant 80 : index
    %c0_145 = arith.constant 0 : index
    %204 = vector.load %arg10[%c80_144, %c0_145] : memref<112x256xf32, #tpu.memory_space<vmem>>, vector<8x256xf32>
    %c88_146 = arith.constant 88 : index
    %c0_147 = arith.constant 0 : index
    %205 = vector.load %arg10[%c88_146, %c0_147] : memref<112x256xf32, #tpu.memory_space<vmem>>, vector<8x256xf32>
    %206 = arith.maximumf %204, %205 : vector<8x256xf32>
    %207 = vector.extract_strided_slice %206 {offsets = [0, 0], sizes = [8, 128], strides = [1, 1]} : vector<8x256xf32> to vector<8x128xf32>
    %208 = vector.extract_strided_slice %206 {offsets = [0, 128], sizes = [8, 128], strides = [1, 1]} : vector<8x256xf32> to vector<8x128xf32>
    %209 = arith.maximumf %207, %208 : vector<8x128xf32>
    %210 = arith.truncf %209 : vector<8x128xf32> to vector<8x128xbf16>
    %c5 = arith.constant 5 : index
    %c0_148 = arith.constant 0 : index
    %c0_149 = arith.constant 0 : index
    %211 = vector.load %arg6[%c5, %c0_148, %c0_149] : memref<7x128x128xbf16, #tpu.memory_space<vmem>>, vector<1x128x128xbf16>
    %212 = vector.shape_cast %211 : vector<1x128x128xbf16> to vector<128x128xbf16>
    %cst_150 = arith.constant dense<0.000000e+00> : vector<8x128xf32>
    %213 = tpu.matmul %210, %212, %cst_150 {dimension_numbers = #tpu.dot_dimension_numbers<[1], [0], [0], [1], [0, 0, 1, 1], [], []>} : vector<8x128xbf16>, vector<128x128xbf16>, vector<8x128xf32> -> vector<8x128xf32>
    %214 = arith.addf %203, %213 : vector<8x128xf32>
    %c96_151 = arith.constant 96 : index
    %c0_152 = arith.constant 0 : index
    %215 = vector.load %arg10[%c96_151, %c0_152] : memref<112x256xf32, #tpu.memory_space<vmem>>, vector<8x256xf32>
    %c104_153 = arith.constant 104 : index
    %c0_154 = arith.constant 0 : index
    %216 = vector.load %arg10[%c104_153, %c0_154] : memref<112x256xf32, #tpu.memory_space<vmem>>, vector<8x256xf32>
    %217 = arith.maximumf %215, %216 : vector<8x256xf32>
    %218 = vector.extract_strided_slice %217 {offsets = [0, 0], sizes = [8, 128], strides = [1, 1]} : vector<8x256xf32> to vector<8x128xf32>
    %219 = vector.extract_strided_slice %217 {offsets = [0, 128], sizes = [8, 128], strides = [1, 1]} : vector<8x256xf32> to vector<8x128xf32>
    %220 = arith.maximumf %218, %219 : vector<8x128xf32>
    %221 = arith.truncf %220 : vector<8x128xf32> to vector<8x128xbf16>
    %c6 = arith.constant 6 : index
    %c0_155 = arith.constant 0 : index
    %c0_156 = arith.constant 0 : index
    %222 = vector.load %arg6[%c6, %c0_155, %c0_156] : memref<7x128x128xbf16, #tpu.memory_space<vmem>>, vector<1x128x128xbf16>
    %223 = vector.shape_cast %222 : vector<1x128x128xbf16> to vector<128x128xbf16>
    %cst_157 = arith.constant dense<0.000000e+00> : vector<8x128xf32>
    %224 = tpu.matmul %221, %223, %cst_157 {dimension_numbers = #tpu.dot_dimension_numbers<[1], [0], [0], [1], [0, 0, 1, 1], [], []>} : vector<8x128xbf16>, vector<128x128xbf16>, vector<8x128xf32> -> vector<8x128xf32>
    %225 = arith.addf %214, %224 : vector<8x128xf32>
    %c0_158 = arith.constant 0 : index
    %c0_159 = arith.constant 0 : index
    %226 = vector.load %arg7[%c0_158, %c0_159] : memref<1x128xf32, #tpu.memory_space<vmem>>, vector<1x128xf32>
    %227 = vector.broadcast %226 : vector<1x128xf32> to vector<8x128xf32>
    %228 = arith.addf %225, %227 : vector<8x128xf32>
    %c0_160 = arith.constant 0 : index
    %c0_161 = arith.constant 0 : index
    %229 = vector.load %arg8[%c0_160, %c0_161] : memref<8x128xf32, #tpu.memory_space<vmem>>, vector<8x128xf32>
    tpu.vector_store %arg8[%c0_160, %c0_161], %228 {strides = array<i32>} : memref<8x128xf32, #tpu.memory_space<vmem>>, vector<8x128xf32>,
    return
  }
  func.func @transform_0(%arg0: i32) -> (i32, i32) {
    %c0_i32 = arith.constant 0 : i32
    %c0_i32_0 = arith.constant 0 : i32
    return %arg0, %c0_i32 : i32, i32
  }
  func.func @transform_1(%arg0: i32) -> (i32, i32, i32) {
    %c0_i32 = arith.constant 0 : i32
    %c0_i32_0 = arith.constant 0 : i32
    %c0_i32_1 = arith.constant 0 : i32
    %c0_i32_2 = arith.constant 0 : i32
    return %c0_i32, %c0_i32_0, %c0_i32_1 : i32, i32, i32
  }
  func.func @transform_2(%arg0: i32) -> (i32, i32) {
    %c0_i32 = arith.constant 0 : i32
    %c0_i32_0 = arith.constant 0 : i32
    %c0_i32_1 = arith.constant 0 : i32
    return %c0_i32, %c0_i32_0 : i32, i32
  }
  func.func @transform_3(%arg0: i32) -> (i32, i32, i32) {
    %c0_i32 = arith.constant 0 : i32
    %c0_i32_0 = arith.constant 0 : i32
    %c0_i32_1 = arith.constant 0 : i32
    %c0_i32_2 = arith.constant 0 : i32
    return %c0_i32, %c0_i32_0, %c0_i32_1 : i32, i32, i32
  }
  func.func @transform_4(%arg0: i32) -> (i32, i32) {
    %c0_i32 = arith.constant 0 : i32
    %c0_i32_0 = arith.constant 0 : i32
    %c0_i32_1 = arith.constant 0 : i32
    return %c0_i32, %c0_i32_0 : i32, i32
  }
  func.func @transform_5(%arg0: i32) -> (i32, i32, i32) {
    %c0_i32 = arith.constant 0 : i32
    %c0_i32_0 = arith.constant 0 : i32
    %c0_i32_1 = arith.constant 0 : i32
    %c0_i32_2 = arith.constant 0 : i32
    return %c0_i32, %c0_i32_0, %c0_i32_1 : i32, i32, i32
  }
  func.func @transform_6(%arg0: i32) -> (i32, i32) {
    %c0_i32 = arith.constant 0 : i32
    %c0_i32_0 = arith.constant 0 : i32
    %c0_i32_1 = arith.constant 0 : i32
    return %c0_i32, %c0_i32_0 : i32, i32
  }
  func.func @transform_7(%arg0: i32) -> (i32, i32) {
    %c0_i32 = arith.constant 0 : i32
    %c0_i32_0 = arith.constant 0 : i32
    return %arg0, %c0_i32 : i32, i32
  }
}

</mosaic_0001>

<bundles_post_ra>
// kernel: cnn_forward.1
= control target key start
LH: loop header
LB: loop body
LE: loop exit
PB: predicated region body
PF: predicated region fallthrough
CT: control target
= control target key end

     0   :  { %12 = vsyncpa [#allocation6], 0  ;;  %s4298_s0 = inlined_call_operand.vmem [shape: f32[240,28], index: 0, kind: input, shape index: {}]   ;;  %s4299_s1 = inlined_call_operand.hbm [shape: bf16[3,28,256], index: 1, kind: input, shape index: {}]   ;;  %s4300_s2 = inlined_call_operand.vmem [shape: f32[1,256], index: 2, kind: input, shape index: {}]   ;;  %s4301_s3 = inlined_call_operand.vmem [shape: bf16[3,128,256], index: 3, kind: input, shape index: {}]   ;;  %s4302_s4 = inlined_call_operand.vmem [shape: f32[1,256], index: 4, kind: input, shape index: {}]   ;;  %s4303_s5 = inlined_call_operand.hbm [shape: bf16[7,128,128], index: 5, kind: input, shape index: {}]   ;;  %s4304_s6 = inlined_call_operand.vmem [shape: f32[1,128], index: 6, kind: input, shape index: {}]   ;;  %s4305_s7 = inlined_call_operand.vmem [shape: f32[8,128], index: 7, kind: output, shape index: {}]  }
   0x1   :  { %13 = vsyncpa [#allocation8], 0  ;;  %s3588_s24 = smov [#allocation5]   ;;  %s3540_s28 = scalar_lea.hbm %s4299_s1, 1536 }
   0x2   :  { %s21_s25 = sshll.u32 %s3588_s24, 4  ;;  %p3541_p0 = scmp.ne.s32.totalorder %s4299_s1, %s3540_s28  ;;  %s22_s25 = int_to_ptr.vmem [resolvable:$true] %s21_s25 }
   0x3   :  { %p3544_p1 = scmp.lt.u32.totalorder %s3540_s28, %s4299_s1 }
   0x5   :  { %p3546_p2 = pnand %p3544_p1, %p3541_p0 }
   0x7   :  { %3549 = shalt.err (!%p3546_p2)
}
   0x8   :  { %s3550_s10 = scalar_lea.vmem %s22_s25, 1536  ;;  %p3555_p4 = scmp.lt.s32.totalorder %s22_s25, %s22_s25 }
   0x9   :  { %p3551_p3 = scmp.ne.s32.totalorder %s22_s25, %s3550_s10  ;;  %p3556_p5 = scmp.lt.s32.totalorder %s3550_s10, %s3550_s10 }
   0xb   :  { %p3557_p6 = por %p3556_p5, %p3555_p4 }
   0xd   :  { %p3558_p7 = pnand %p3557_p6, %p3551_p3 }
   0xf   :  { %3561 = shalt.err (!%p3558_p7)
}
  0x10   :  { %s3589_s11 = smov 128   ;;  %s3590_s12 = smov 8  }
  0x11   :  { %27 = dma.hbm_to_vmem [thread:$0]  %s4299_s1, 1536, %s22_s25, [#allocation6], %s3589_s11, %s3589_s11, %s3590_s12  }
  0x12   :  { %s3591_s15 = smov [#allocation7]   ;;  %s3562_s19 = scalar_lea.hbm %s4303_s5, 7168 }
  0x13   :  { %s39_s16 = sshll.u32 %s3591_s15, 4  ;;  %p3563_p8 = scmp.ne.s32.totalorder %s4303_s5, %s3562_s19  ;;  %s40_s16 = int_to_ptr.vmem [resolvable:$true] %s39_s16 }
  0x14   :  { %p3566_p9 = scmp.lt.u32.totalorder %s3562_s19, %s4303_s5 }
  0x16   :  { %p3568_p10 = pnand %p3566_p9, %p3563_p8 }
  0x18   :  { %3571 = shalt.err (!%p3568_p10)
}
  0x19   :  { %s3572_s24 = scalar_lea.vmem %s40_s16, 7168  ;;  %p3577_p12 = scmp.lt.s32.totalorder %s40_s16, %s40_s16 }
  0x1a   :  { %p3573_p11 = scmp.ne.s32.totalorder %s40_s16, %s3572_s24  ;;  %p3578_p13 = scmp.lt.s32.totalorder %s3572_s24, %s3572_s24 }
  0x1c   :  { %p3579_p0 = por %p3578_p13, %p3577_p12 }
  0x1e   :  { %p3580_p1 = pnand %p3579_p0, %p3573_p11 }
  0x20   :  { %3583 = shalt.err (!%p3580_p1)
}
  0x21   :  { %s3592_s1 = smov 64   ;;  %s3593_s25 = smov 4  }
  0x22   :  { %45 = dma.hbm_to_vmem [thread:$0]  %s4303_s5, 7168, %s40_s16, [#allocation8], %s3592_s1, %s3592_s1, %s3593_s25  }
  0x23   :  { %3584 = dma.done.wait [#allocation6], 1536  }
  0x24   :  { %3585 = vsyncadd [#allocation6], 4294965760 }
  0x25   :  { %3586 = dma.done.wait [#allocation8], 7168  }
  0x26   :  { %3587 = vsyncadd [#allocation8], 4294960128  ;;  %v3594_v0 = vmov 0   ;;  %v3394_v1 = vld [vmem:[#allocation5 + $0x24] ss:$8 sps:$4 sm:$0xff]   ;;  %vm182_vm0 = vcmask 1045504  }
  0x27   :  { %221 = vmatprep.mubr.bf16.mxu0 %v3594_v0  ;;  %1411 = vmatprep.mubr.bf16.mxu1 %v3594_v0  ;;  %v3396_v2 = vld [vmem:[#allocation5 + $0x20] ss:$8 sps:$4 sm:$0xff]   ;;  %v3397_v3 = vld [vmem:[#allocation5 + $0x34] ss:$8 sps:$4 sm:$0x3f]   ;;  %vm139_vm1 = vcmask 228352  }
  0x28   :  { %189 = vmatprep.subr.bf16.mxu0 %v3394_v1  ;;  %v3399_v4 = vld [vmem:[#allocation5 + $0x30] ss:$8 sps:$4 sm:$0x3f]   ;;  %v3666_v5 = vld [vmem:[%s4298_s0 + $0x8] sm:$0xff]  ;;  %v59_v11 = vld [vmem:[%s4298_s0 + $0x20] sm:$0xff]  ;;  %vm3596_vm2 = vmmov 0  }
  0x29   :  { %190 = vmatpush1.bf16.msra.mxu0 %v3396_v2  ;;  %v57_v6 = vld [vmem:[%s4298_s0 + $0x10] sm:$0xff]  ;;  %v184_v7 = vsel %vm182_vm0, %v3399_v4, 0  ;;  %v3402_v8 = vld [vmem:[#allocation5 + $0x4] ss:$8 sps:$4 sm:$0xff]   ;;  %v58_v9 = vld [vmem:[%s4298_s0 + $0x18] sm:$0xff] }
  0x2a   :  { %2824 = vmatprep.subr.msk.bf16.mxu0 %vm182_vm0, %v3397_v3  ;;  %v102_v10 = vpack.c.bf16 %v57_v6, %v3666_v5  ;;  %v60_v12 = vld [vmem:[%s4298_s0 + $0x28] sm:$0xff]  ;;  %v3683_v13 = vpack.c.bf16 %v58_v9, %v57_v6  ;;  %v61_v16 = vld [vmem:[%s4298_s0 + $0x30] sm:$0xff]  ;;  %v62_v17 = vld [vmem:[%s4298_s0 + $0x38] sm:$0xff]  ;;  %v103_v22 = vpack.c.bf16 %v59_v11, %v58_v9 }
  0x2b   :  { %v3400_v14 = vld [vmem:[#allocation5] ss:$8 sps:$4 sm:$0xff]   ;;  %v3685_v15 = vpack.c.bf16 %v60_v12, %v59_v11  ;;  %v3403_v18 = vld [vmem:[#allocation5 + $0x14] ss:$8 sps:$4 sm:$0x3f]   ;;  %v3695_v20 = vpack.c.bf16 %v62_v17, %v61_v16  ;;  %v104_v27 = vpack.c.bf16 %v61_v16, %v60_v12 }
  0x2c   :  { %v3405_v19 = vld [vmem:[#allocation5 + $0x10] ss:$8 sps:$4 sm:$0x3f]   ;;  %v63_v23 = vld [vmem:[%s4298_s0 + $0x40] sm:$0xff]  ;;  %v64_v24 = vld [vmem:[%s4298_s0 + $0x48] sm:$0xff] }
  0x2d   :  { %192 = vmatpush1.bf16.msra.mxu0 %v184_v7  ;;  %v423_v21 = vsel %vm182_vm0, %v3405_v19, 0  ;;  %v3408_v25 = vld [vmem:[#allocation5 + $0x44] ss:$8 sps:$4 sm:$0xff]   ;;  %v3707_v26 = vpack.c.bf16 %v64_v24, %v63_v23  ;;  %v65_v28 = vld [vmem:[%s4298_s0 + $0x50] sm:$0xff]  ;;  %v66_v29 = vld [vmem:[%s4298_s0 + $0x58] sm:$0xff]  ;;  %v105_v31 = vpack.c.bf16 %v63_v23, %v62_v17 }
  0x2e   :  { %428 = vmatprep.subr.bf16.mxu0 %v3402_v8  ;;  %v3717_v30 = vpack.c.bf16 %v66_v29, %v65_v28  ;;  %v67_v32 = vld [vmem:[%s4298_s0 + $0x60] sm:$0xff]  ;;  %v68_v33 = vld [vmem:[%s4298_s0 + $0x68] sm:$0xff]  ;;  %v106_v35 = vpack.c.bf16 %v65_v28, %v64_v24  ;;  %v69_v36 = vld [vmem:[%s4298_s0 + $0x70] sm:$0xff] }
  0x2f   :  { %v3727_v34 = vpack.c.bf16 %v68_v33, %v67_v32  ;;  %v70_v37 = vld [vmem:[%s4298_s0 + $0x78] sm:$0xff]  ;;  %v107_v39 = vpack.c.bf16 %v67_v32, %v66_v29  ;;  %v71_v40 = vld [vmem:[%s4298_s0 + $0x80] sm:$0xff]  ;;  %v72_v41 = vld [vmem:[%s4298_s0 + $0x88] sm:$0xff]  ;;  %v108_v43 = vpack.c.bf16 %v69_v36, %v68_v33 }
  0x30   :  { %2825 = vmatmul.mubr.msk.bf16.vlgmr.msra.gmra.mrb[0].mxu0 %vm139_vm1, %v102_v10  ;;  %v3737_v38 = vpack.c.bf16 %v70_v37, %v69_v36  ;;  %v3747_v42 = vpack.c.bf16 %v72_v41, %v71_v40  ;;  %v73_v44 = vld [vmem:[%s4298_s0 + $0x90] sm:$0xff]  ;;  %v74_v45 = vld [vmem:[%s4298_s0 + $0x98] sm:$0xff]  ;;  %v109_v47 = vpack.c.bf16 %v71_v40, %v70_v37  ;;  %v75_v48 = vld [vmem:[%s4298_s0 + $0xa0] sm:$0xff] }
  0x31   :  { %429 = vmatpush1.bf16.msra.mxu0 %v3400_v14  ;;  %231 = vmatprep.mubr.bf16.mxu0 %v3594_v0  ;;  %v3757_v46 = vpack.c.bf16 %v74_v45, %v73_v44  ;;  %v76_v49 = vld [vmem:[%s4298_s0 + $0xa8] sm:$0xff]  ;;  %v110_v51 = vpack.c.bf16 %v73_v44, %v72_v41  ;;  %v77_v52 = vld [vmem:[%s4298_s0 + $0xb0] sm:$0xff]  ;;  %v78_v53 = vld [vmem:[%s4298_s0 + $0xb8] sm:$0xff]  ;;  %v111_v55 = vpack.c.bf16 %v75_v48, %v74_v45 }
  0x32   :  { %2843 = vmatprep.subr.msk.bf16.mxu0 %vm182_vm0, %v3403_v18  ;;  %v3767_v50 = vpack.c.bf16 %v76_v49, %v75_v48  ;;  %v3777_v54 = vpack.c.bf16 %v78_v53, %v77_v52  ;;  %v112_v56 = vpack.c.bf16 %v77_v52, %v76_v49  ;;  %v79_v57 = vld [vmem:[%s4298_s0 + $0xc0] sm:$0xff]  ;;  %v80_v59 = vld [vmem:[%s4298_s0 + $0xc8] sm:$0xff]  ;;  %v81_v60 = vld [vmem:[%s4298_s0 + $0xd0] sm:$0xff] }
  0x33   :  { %v113_v58 = vpack.c.bf16 %v79_v57, %v78_v53  ;;  %v114_v61 = vpack.c.bf16 %v81_v60, %v80_v59  ;;  %v82_v62 = vld [vmem:[%s4298_s0 + $0xd8] sm:$0xff]  ;;  %v3802_v63 = vld [vmem:[%s4298_s0 + $0xe0] sm:$0xff]  ;;  %v95_v12 = vpack.c.bf16 %v80_v59, %v79_v57 }
  0x34   :  { %v115_v1 = vpack.c.bf16 %v3802_v63, %v82_v62  ;;  %v55_v2 = vld [vmem:[%s4298_s0] sm:$0xff]  ;;  %v3409_v6 = vld [vmem:[#allocation5 + $0x54] ss:$8 sps:$4 sm:$0x3f]   ;;  %v3417_v11 = vld [vmem:[%s4301_s3 + $0x90] ss:$8 sps:$4 sm:$0xff]   ;;  %v96_v17 = vpack.c.bf16 %v82_v62, %v81_v60 }
  0x35   :  { %431 = vmatpush1.bf16.msra.mxu0 %v423_v21  ;;  %v83_v3 = vpack.c.bf16 %v3666_v5, %v55_v2  ;;  %v3406_v4 = vld [vmem:[#allocation5 + $0x40] ss:$8 sps:$4 sm:$0xff]   ;;  %v3411_v7 = vld [vmem:[#allocation5 + $0x50] ss:$8 sps:$4 sm:$0x3f]  }
  0x36   :  { %714 = vmatprep.subr.bf16.mxu0 %v3408_v25  ;;  %v709_v8 = vsel %vm182_vm0, %v3411_v7, 0  ;;  %v3412_v5 = vld [vmem:[%s4301_s3 + $0x84] ss:$8 sps:$4 sm:$0xff]   ;;  %v3414_v9 = vld [vmem:[%s4301_s3 + $0x80] ss:$8 sps:$4 sm:$0xff]  }
  0x37   :  { %v3415_v10 = vld [vmem:[%s4301_s3 + $0x94] ss:$8 sps:$4 sm:$0xff]   ;;  %1379 = vmatprep.subr.bf16.mxu1 %v3412_v5  ;;  %v3418_v14 = vld [vmem:[%s4301_s3 + $0xa4] ss:$8 sps:$4 sm:$0xff]   ;;  %v3420_v16 = vld [vmem:[%s4301_s3 + $0xa0] ss:$8 sps:$4 sm:$0xff]  }
  0x38   :  { %2826 = vmatmul.mubr.msk.bf16.gmra.mrb[4].mxu0 %vm139_vm1, %v103_v22  ;;  %1380 = vmatpush1.bf16.msra.mxu1 %v3414_v9  ;;  %v3424_v18 = vld [vmem:[%s4301_s3 + $0xc4] ss:$8 sps:$4 sm:$0xff]   ;;  %v3426_v19 = vld [vmem:[%s4301_s3 + $0xc0] ss:$8 sps:$4 sm:$0xff]   ;;  %v3429_v21 = vld [vmem:[%s4301_s3 + $0xd0] ss:$8 sps:$4 sm:$0xff]  }
  0x39   :  { %241 = vmatprep.mubr.bf16.mxu0 %v3594_v0  ;;  %1381 = vmatprep.subr.bf16.mxu1 %v3415_v10  ;;  %v3595_v22 = vmov 0.0   ;;  %v3430_v23 = vld [vmem:[%s4301_s3 + $0xe4] ss:$8 sps:$4 sm:$0xff]   ;;  %v3432_v24 = vld [vmem:[%s4301_s3 + $0xe0] ss:$8 sps:$4 sm:$0xff]  }
  0x3a   :  { %v628_v25 = vld [vmem:[%s4298_s0 + $0xe8] sm:$0xff]  ;;  %v3435_v28 = vld [vmem:[%s4301_s3 + $0xf0] ss:$8 sps:$4 sm:$0xff]   ;;  %v943_v33 = vld [vmem:[%s4300_s2] sm:$0x3] }
  0x3b   :  { %v3438_v29 = vld [vmem:[%s4301_s3 + $0x4] ss:$8 sps:$4 sm:$0xff]  }
  0x3c   :  { %1382 = vmatpush1.bf16.msra.mxu1 %v3417_v11  ;;  %v3436_v11 = vld [vmem:[%s4301_s3] ss:$8 sps:$4 sm:$0xff]  }
  0x3d   :  { %1383 = vmatprep.subr.bf16.mxu1 %v3418_v14 }
  0x40   :  { %2827 = vmatmul.mubr.msk.bf16.gmra.mrb[8].mxu0 %vm139_vm1, %v104_v27  ;;  %1384 = vmatpush1.bf16.msra.mxu1 %v3420_v16  ;;  %v642_v27 = vpack.c.bf16 %v628_v25, %v3802_v63  ;;  %v3441_v16 = vld [vmem:[%s4301_s3 + $0x14] ss:$8 sps:$4 sm:$0xff]  }
  0x41   :  { %251 = vmatprep.mubr.bf16.mxu0 %v3594_v0 }
  0x48   :  { %2828 = vmatmul.mubr.msk.bf16.gmra.mrb[12].mxu0 %vm139_vm1, %v105_v31 }
  0x49   :  { %261 = vmatprep.mubr.bf16.mxu0 %v3594_v0 }
  0x50   :  { %2829 = vmatmul.mubr.msk.bf16.gmra.mrb[16].mxu0 %vm139_vm1, %v106_v35 }
  0x51   :  { %271 = vmatprep.mubr.bf16.mxu0 %v3594_v0 }
  0x58   :  { %2830 = vmatmul.mubr.msk.bf16.gmra.mrb[20].mxu0 %vm139_vm1, %v107_v39 }
  0x59   :  { %281 = vmatprep.mubr.bf16.mxu0 %v3594_v0 }
  0x60   :  { %2831 = vmatmul.mubr.msk.bf16.gmra.mrb[24].mxu0 %vm139_vm1, %v108_v43 }
  0x61   :  { %291 = vmatprep.mubr.bf16.mxu0 %v3594_v0 }
  0x68   :  { %2832 = vmatmul.mubr.msk.bf16.gmra.mrb[28].mxu0 %vm139_vm1, %v109_v47 }
  0x69   :  { %301 = vmatprep.mubr.bf16.mxu0 %v3594_v0 }
  0x70   :  { %2833 = vmatmul.mubr.msk.bf16.gmra.mrb[32].mxu0 %vm139_vm1, %v110_v51 }
  0x71   :  { %311 = vmatprep.mubr.bf16.mxu0 %v3594_v0 }
  0x78   :  { %2834 = vmatmul.mubr.msk.bf16.gmra.mrb[36].mxu0 %vm139_vm1, %v111_v55 }
  0x79   :  { %321 = vmatprep.mubr.bf16.mxu0 %v3594_v0 }
  0x80   :  { %2835 = vmatmul.mubr.msk.bf16.gmra.mrb[40].mxu0 %vm139_vm1, %v112_v56 }
  0x81   :  { %331 = vmatprep.mubr.bf16.mxu0 %v3594_v0 }
  0x88   :  { %2836 = vmatmul.mubr.msk.bf16.gmra.mrb[44].mxu0 %vm139_vm1, %v113_v58 }
  0x89   :  { %341 = vmatprep.mubr.bf16.mxu0 %v3594_v0 }
  0x90   :  { %2837 = vmatmul.mubr.msk.bf16.gmra.mrb[48].mxu0 %vm139_vm1, %v114_v61 }
  0x91   :  { %351 = vmatprep.mubr.bf16.mxu0 %v3594_v0 }
  0x98   :  { %2838 = vmatmul.mubr.msk.bf16.gmra.mrb[52].mxu0 %vm139_vm1, %v115_v1 }
  0x99   :  { %460 = vmatprep.mubr.bf16.mxu0 %v3594_v0 }
  0xa0   :  { %2844 = vmatmul.mubr.msk.bf16.vlgmr.msra.gmra.mrb[0].mxu0 %vm139_vm1, %v83_v3 }
  0xa1   :  { %715 = vmatpush1.bf16.msra.mxu0 %v3406_v4  ;;  %470 = vmatprep.mubr.bf16.mxu0 %v3594_v0 }
  0xa2   :  { %2862 = vmatprep.subr.msk.bf16.mxu0 %vm182_vm0, %v3409_v6 }
  0xa5   :  { %717 = vmatpush1.bf16.msra.mxu0 %v709_v8 }
  0xa6   :  { %3177 = vmatprep.subr.bf16.mxu0 %v3595_v22 }
  0xa8   :  { %2845 = vmatmul.mubr.msk.bf16.gmra.mrb[4].mxu0 %vm139_vm1, %v3683_v13 }
  0xa9   :  { %480 = vmatprep.mubr.bf16.mxu0 %v3594_v0 }
  0xb0   :  { %2846 = vmatmul.mubr.msk.bf16.gmra.mrb[8].mxu0 %vm139_vm1, %v3685_v15 }
  0xb1   :  { %490 = vmatprep.mubr.bf16.mxu0 %v3594_v0 }
  0xb8   :  { %2847 = vmatmul.mubr.msk.bf16.gmra.mrb[12].mxu0 %vm139_vm1, %v3695_v20 }
  0xb9   :  { %500 = vmatprep.mubr.bf16.mxu0 %v3594_v0 }
  0xc0   :  { %2848 = vmatmul.mubr.msk.bf16.gmra.mrb[16].mxu0 %vm139_vm1, %v3707_v26 }
  0xc1   :  { %510 = vmatprep.mubr.bf16.mxu0 %v3594_v0 }
  0xc8   :  { %2849 = vmatmul.mubr.msk.bf16.gmra.mrb[20].mxu0 %vm139_vm1, %v3717_v30 }
  0xc9   :  { %520 = vmatprep.mubr.bf16.mxu0 %v3594_v0 }
  0xd0   :  { %2850 = vmatmul.mubr.msk.bf16.gmra.mrb[24].mxu0 %vm139_vm1, %v3727_v34 }
  0xd1   :  { %530 = vmatprep.mubr.bf16.mxu0 %v3594_v0 }
  0xd8   :  { %2851 = vmatmul.mubr.msk.bf16.gmra.mrb[28].mxu0 %vm139_vm1, %v3737_v38 }
  0xd9   :  { %540 = vmatprep.mubr.bf16.mxu0 %v3594_v0 }
  0xe0   :  { %2852 = vmatmul.mubr.msk.bf16.gmra.mrb[32].mxu0 %vm139_vm1, %v3747_v42 }
  0xe1   :  { %550 = vmatprep.mubr.bf16.mxu0 %v3594_v0 }
  0xe8   :  { %2853 = vmatmul.mubr.msk.bf16.gmra.mrb[36].mxu0 %vm139_vm1, %v3757_v46 }
  0xe9   :  { %560 = vmatprep.mubr.bf16.mxu0 %v3594_v0 }
  0xf0   :  { %2854 = vmatmul.mubr.msk.bf16.gmra.mrb[40].mxu0 %vm139_vm1, %v3767_v50 }
  0xf1   :  { %570 = vmatprep.mubr.bf16.mxu0 %v3594_v0 }
  0xf8   :  { %2855 = vmatmul.mubr.msk.bf16.gmra.mrb[44].mxu0 %vm139_vm1, %v3777_v54 }
  0xf9   :  { %580 = vmatprep.mubr.bf16.mxu0 %v3594_v0 }
 0x100   :  { %2856 = vmatmul.mubr.msk.bf16.gmra.mrb[48].mxu0 %vm139_vm1, %v95_v12 }
 0x101   :  { %590 = vmatprep.mubr.bf16.mxu0 %v3594_v0 }
 0x108   :  { %2857 = vmatmul.mubr.msk.bf16.gmra.mrb[52].mxu0 %vm139_vm1, %v96_v17 }
 0x109   :  { %746 = vmatprep.mubr.bf16.mxu0 %v3594_v0 }
 0x110   :  { %2863 = vmatmul.mubr.msk.bf16.vlgmr.msra.gmra.mrb[0].mxu0 %vm139_vm1, %v3683_v13  ;;  %v3421_v13 = vld [vmem:[%s4301_s3 + $0xb4] ss:$8 sps:$4 sm:$0xff]  }
 0x111   :  { %756 = vmatprep.mubr.bf16.mxu0 %v3594_v0  ;;  %1385 = vmatprep.subr.bf16.mxu1 %v3421_v13 }
 0x118   :  { %2864 = vmatmul.mubr.msk.bf16.gmra.mrb[4].mxu0 %vm139_vm1, %v3685_v15  ;;  %v3423_v15 = vld [vmem:[%s4301_s3 + $0xb0] ss:$8 sps:$4 sm:$0xff]  }
 0x119   :  { %766 = vmatprep.mubr.bf16.mxu0 %v3594_v0  ;;  %1386 = vmatpush1.bf16.msra.mxu1 %v3423_v15 }
 0x11a   :  { %1387 = vmatprep.subr.bf16.mxu1 %v3424_v18 }
 0x11d   :  { %1388 = vmatpush1.bf16.msra.mxu1 %v3426_v19 }
 0x120   :  { %2865 = vmatmul.mubr.msk.bf16.gmra.mrb[8].mxu0 %vm139_vm1, %v3695_v20  ;;  %v3427_v20 = vld [vmem:[%s4301_s3 + $0xd4] ss:$8 sps:$4 sm:$0xff]  }
 0x121   :  { %776 = vmatprep.mubr.bf16.mxu0 %v3594_v0  ;;  %1389 = vmatprep.subr.bf16.mxu1 %v3427_v20  ;;  %v3439_v20 = vld [vmem:[%s4301_s3 + $0x10] ss:$8 sps:$4 sm:$0xff]  }
 0x122   :  { %1390 = vmatpush1.bf16.msra.mxu1 %v3429_v21 }
 0x123   :  { %1391 = vmatprep.subr.bf16.mxu1 %v3430_v23 }
 0x126   :  { %1392 = vmatpush1.bf16.msra.mxu1 %v3432_v24  ;;  %v3444_v24 = vld [vmem:[%s4301_s3 + $0x24] ss:$8 sps:$4 sm:$0xff]  }
 0x128   :  { %2866 = vmatmul.mubr.msk.bf16.gmra.mrb[12].mxu0 %vm139_vm1, %v3707_v26  ;;  %v3433_v26 = vld [vmem:[%s4301_s3 + $0xf4] ss:$8 sps:$4 sm:$0xff]  }
 0x129   :  { %786 = vmatprep.mubr.bf16.mxu0 %v3594_v0  ;;  %1393 = vmatprep.subr.bf16.mxu1 %v3433_v26 }
 0x12a   :  { %1394 = vmatpush1.bf16.msra.mxu1 %v3435_v28 }
 0x12b   :  { %1562 = vmatprep.subr.bf16.mxu1 %v3438_v29 }
 0x130   :  { %2867 = vmatmul.mubr.msk.bf16.gmra.mrb[16].mxu0 %vm139_vm1, %v3717_v30  ;;  %v945_v30 = vlaneseq }
 0x131   :  { %796 = vmatprep.mubr.bf16.mxu0 %v3594_v0 }
 0x132   :  { %v3946_v31 = vshrl.u32 %v945_v30, 7 }
 0x134   :  { %v947_v32 = vsub.s32 0, %v3946_v31 }
 0x136   :  { %v3955_v35 = vrot.slane %v943_v33, %v947_v32 }
 0x138   :  { %2868 = vmatmul.mubr.msk.bf16.gmra.mrb[20].mxu0 %vm139_vm1, %v3727_v34  ;;  %v951_v34 = vsub.s32 1, %v3946_v31 }
 0x139   :  { %806 = vmatprep.mubr.bf16.mxu0 %v3594_v0 }
 0x13a   :  { %v3959_v36 = vrot.slane %v943_v33, %v951_v34 }
 0x140   :  { %2869 = vmatmul.mubr.msk.bf16.gmra.mrb[24].mxu0 %vm139_vm1, %v3737_v38 }
 0x141   :  { %816 = vmatprep.mubr.bf16.mxu0 %v3594_v0 }
 0x148   :  { %2870 = vmatmul.mubr.msk.bf16.gmra.mrb[28].mxu0 %vm139_vm1, %v3747_v42 }
 0x149   :  { %826 = vmatprep.mubr.bf16.mxu0 %v3594_v0 }
 0x150   :  { %2871 = vmatmul.mubr.msk.bf16.gmra.mrb[32].mxu0 %vm139_vm1, %v3757_v46 }
 0x151   :  { %836 = vmatprep.mubr.bf16.mxu0 %v3594_v0 }
 0x158   :  { %2872 = vmatmul.mubr.msk.bf16.gmra.mrb[36].mxu0 %vm139_vm1, %v3767_v50 }
 0x159   :  { %846 = vmatprep.mubr.bf16.mxu0 %v3594_v0 }
 0x160   :  { %2873 = vmatmul.mubr.msk.bf16.gmra.mrb[40].mxu0 %vm139_vm1, %v3777_v54 }
 0x161   :  { %856 = vmatprep.mubr.bf16.mxu0 %v3594_v0 }
 0x168   :  { %2874 = vmatmul.mubr.msk.bf16.gmra.mrb[44].mxu0 %vm139_vm1, %v95_v12 }
 0x169   :  { %866 = vmatprep.mubr.bf16.mxu0 %v3594_v0 }
 0x170   :  { %2875 = vmatmul.mubr.msk.bf16.gmra.mrb[48].mxu0 %vm139_vm1, %v96_v17 }
 0x171   :  { %876 = vmatprep.mubr.bf16.mxu0 %v3594_v0 }
 0x178   :  { %2876 = vmatmul.mubr.msk.bf16.gmra.mrb[52].mxu0 %vm139_vm1, %v642_v27 }
 0x179   :  { %3193 = vmatprep.mubr.msk.bf16.mxu0 %vm3596_vm2, %v3595_v22 }
 0x1e3   :  { %v748_v37 = vpop.f32.mrb[0].mxu0 }
 0x1e4   :  { %v955_v38 = vadd.f32 %v3955_v35, %v748_v37  ;;  %v750_v39 = vpop.f32.mrb[1].mxu0  ;;  %v3442_v37 = vld [vmem:[%s4301_s3 + $0x20] ss:$8 sps:$4 sm:$0xff]  }
 0x1e5   :  { %v956_v40 = vadd.f32 %v3959_v36, %v750_v39  ;;  %v752_v41 = vpop.f32.mrb[2].mxu0  ;;  %v3447_v39 = vld [vmem:[%s4301_s3 + $0x34] ss:$8 sps:$4 sm:$0xff]  }
 0x1e6   :  { %v957_v42 = vadd.f32 %v3955_v35, %v752_v41  ;;  %v754_v43 = vpop.f32.mrb[3].mxu0  ;;  %v1011_v45 = vmax.f32 %v955_v38, 0.0 }
 0x1e7   :  { %v958_v44 = vadd.f32 %v3959_v36, %v754_v43  ;;  %v1012_v47 = vmax.f32 %v956_v40, 0.0 }
 0x1e8   :  { %v1013_v46 = vmax.f32 %v957_v42, 0.0 }
 0x1e9   :  { %v1014_v48 = vmax.f32 %v958_v44, 0.0 }
 0x1ea   :  { %v1129_v49 = vmax.f32 %v1011_v45, %v1013_v46  ;;  %v3445_v46 = vld [vmem:[%s4301_s3 + $0x30] ss:$8 sps:$4 sm:$0xff]  }
 0x1eb   :  { %v1130_v50 = vmax.f32 %v1012_v47, %v1014_v48  ;;  %v758_v51 = vpop.f32.mrb[4].mxu0 }
 0x1ec   :  { %v959_v52 = vadd.f32 %v3955_v35, %v758_v51  ;;  %v760_v53 = vpop.f32.mrb[5].mxu0 }
 0x1ed   :  { %v3966_v54 = vmax.f32 %v1129_v49, %v1130_v50  ;;  %v960_v55 = vadd.f32 %v3959_v36, %v760_v53  ;;  %v762_v56 = vpop.f32.mrb[6].mxu0  ;;  %v3450_v49 = vld [vmem:[%s4301_s3 + $0x44] ss:$8 sps:$4 sm:$0xff]  }
 0x1ee   :  { %v961_v57 = vadd.f32 %v3955_v35, %v762_v56  ;;  %v764_v58 = vpop.f32.mrb[7].mxu0  ;;  %v1015_v60 = vmax.f32 %v959_v52, 0.0 }
 0x1ef   :  { %v962_v59 = vadd.f32 %v3959_v36, %v764_v58  ;;  %v1016_v62 = vmax.f32 %v960_v55, 0.0  ;;  %v3448_v58 = vld [vmem:[%s4301_s3 + $0x40] ss:$8 sps:$4 sm:$0xff]  }
 0x1f0   :  { %v1017_v61 = vmax.f32 %v961_v57, 0.0 }
 0x1f1   :  { %v1018_v63 = vmax.f32 %v962_v59, 0.0 }
 0x1f2   :  { %v1137_v1 = vmax.f32 %v1015_v60, %v1017_v61  ;;  %v3453_v61 = vld [vmem:[%s4301_s3 + $0x54] ss:$8 sps:$4 sm:$0xff]  }
 0x1f3   :  { %v1138_v2 = vmax.f32 %v1016_v62, %v1018_v63  ;;  %v768_v3 = vpop.f32.mrb[8].mxu0 }
 0x1f4   :  { %v963_v4 = vadd.f32 %v3955_v35, %v768_v3  ;;  %v770_v6 = vpop.f32.mrb[9].mxu0 }
 0x1f5   :  { %v1139_v7 = vmax.f32 %v1137_v1, %v1138_v2  ;;  %v964_v8 = vadd.f32 %v3959_v36, %v770_v6  ;;  %v772_v5 = vpop.f32.mrb[10].mxu0 }
 0x1f6   :  { %v965_v9 = vadd.f32 %v3955_v35, %v772_v5  ;;  %v774_v10 = vpop.f32.mrb[11].mxu0  ;;  %v1019_v17 = vmax.f32 %v963_v4, 0.0  ;;  %v3451_v4 = vld [vmem:[%s4301_s3 + $0x50] ss:$8 sps:$4 sm:$0xff]  }
 0x1f7   :  { %v966_v12 = vadd.f32 %v3959_v36, %v774_v10  ;;  %v1275_v14 = vpack.c.bf16 %v1139_v7, %v3966_v54  ;;  %v1020_v15 = vmax.f32 %v964_v8, 0.0  ;;  %v3456_v8 = vld [vmem:[%s4301_s3 + $0x64] ss:$8 sps:$4 sm:$0xff]  }
 0x1f8   :  { %v1021_v13 = vmax.f32 %v965_v9, 0.0 }
 0x1f9   :  { %v1022_v18 = vmax.f32 %v966_v12, 0.0  ;;  %1412 = vmatmul.mubr.bf16.vlgmr.msra.gmra.mrb[0].mxu1 %v1275_v14 }
 0x1fa   :  { %v1145_v19 = vmax.f32 %v1019_v17, %v1021_v13  ;;  %1421 = vmatprep.mubr.bf16.mxu1 %v3594_v0  ;;  %1563 = vmatpush1.bf16.msra.mxu1 %v3436_v11  ;;  %v3454_v17 = vld [vmem:[%s4301_s3 + $0x60] ss:$8 sps:$4 sm:$0xff]  }
 0x1fb   :  { %v1146_v21 = vmax.f32 %v1020_v15, %v1022_v18  ;;  %v778_v23 = vpop.f32.mrb[12].mxu0  ;;  %1564 = vmatprep.subr.bf16.mxu1 %v3441_v16  ;;  %v3459_v15 = vld [vmem:[%s4301_s3 + $0x74] ss:$8 sps:$4 sm:$0xff]  }
 0x1fc   :  { %v967_v25 = vadd.f32 %v3955_v35, %v778_v23  ;;  %v780_v26 = vpop.f32.mrb[13].mxu0 }
 0x1fd   :  { %v1147_v27 = vmax.f32 %v1145_v19, %v1146_v21  ;;  %v968_v28 = vadd.f32 %v3959_v36, %v780_v26  ;;  %v782_v29 = vpop.f32.mrb[14].mxu0 }
 0x1fe   :  { %v969_v30 = vadd.f32 %v3955_v35, %v782_v29  ;;  %v784_v33 = vpop.f32.mrb[15].mxu0  ;;  %1565 = vmatpush1.bf16.msra.mxu1 %v3439_v20  ;;  %v1023_v41 = vmax.f32 %v967_v25, 0.0  ;;  %v3457_v25 = vld [vmem:[%s4301_s3 + $0x70] ss:$8 sps:$4 sm:$0xff]  }
 0x1ff   :  { %v970_v38 = vadd.f32 %v3959_v36, %v784_v33  ;;  %1566 = vmatprep.subr.bf16.mxu1 %v3444_v24  ;;  %v3999_v40 = vpack.c.bf16 %v1147_v27, %v1139_v7  ;;  %v1024_v43 = vmax.f32 %v968_v28, 0.0  ;;  %v3462_v28 = vld [vmem:[%s4301_s3 + $0x104] ss:$8 sps:$4 sm:$0xff]  }
 0x200   :  { %v1025_v42 = vmax.f32 %v969_v30, 0.0 }
 0x201   :  { %v1026_v44 = vmax.f32 %v970_v38, 0.0 }
 0x202   :  { %v1153_v45 = vmax.f32 %v1023_v41, %v1025_v42  ;;  %1567 = vmatpush1.bf16.msra.mxu1 %v3442_v37 }
 0x203   :  { %v1154_v47 = vmax.f32 %v1024_v43, %v1026_v44  ;;  %v788_v48 = vpop.f32.mrb[16].mxu0  ;;  %1568 = vmatprep.subr.bf16.mxu1 %v3447_v39 }
 0x204   :  { %v971_v50 = vadd.f32 %v3955_v35, %v788_v48  ;;  %v790_v51 = vpop.f32.mrb[17].mxu0 }
 0x205   :  { %v1155_v52 = vmax.f32 %v1153_v45, %v1154_v47  ;;  %v972_v53 = vadd.f32 %v3959_v36, %v790_v51  ;;  %v792_v55 = vpop.f32.mrb[18].mxu0 }
 0x206   :  { %v973_v56 = vadd.f32 %v3955_v35, %v792_v55  ;;  %v794_v57 = vpop.f32.mrb[19].mxu0  ;;  %1569 = vmatpush1.bf16.msra.mxu1 %v3445_v46  ;;  %v1027_v62 = vmax.f32 %v971_v50, 0.0 }
 0x207   :  { %v974_v59 = vadd.f32 %v3959_v36, %v794_v57  ;;  %v1276_v60 = vpack.c.bf16 %v1155_v52, %v1147_v27  ;;  %1570 = vmatprep.subr.bf16.mxu1 %v3450_v49  ;;  %v1028_v1 = vmax.f32 %v972_v53, 0.0 }
 0x208   :  { %v1029_v63 = vmax.f32 %v973_v56, 0.0 }
 0x209   :  { %v1030_v2 = vmax.f32 %v974_v59, 0.0  ;;  %1422 = vmatmul.mubr.bf16.gmra.mrb[4].mxu1 %v1276_v60 }
 0x20a   :  { %v1161_v3 = vmax.f32 %v1027_v62, %v1029_v63  ;;  %1431 = vmatprep.mubr.bf16.mxu1 %v3594_v0  ;;  %1571 = vmatpush1.bf16.msra.mxu1 %v3448_v58 }
 0x20b   :  { %v1162_v6 = vmax.f32 %v1028_v1, %v1030_v2  ;;  %v798_v7 = vpop.f32.mrb[20].mxu0  ;;  %1572 = vmatprep.subr.bf16.mxu1 %v3453_v61 }
 0x20c   :  { %v975_v5 = vadd.f32 %v3955_v35, %v798_v7  ;;  %v800_v9 = vpop.f32.mrb[21].mxu0 }
 0x20d   :  { %v1163_v10 = vmax.f32 %v1161_v3, %v1162_v6  ;;  %v976_v11 = vadd.f32 %v3959_v36, %v800_v9  ;;  %v802_v12 = vpop.f32.mrb[22].mxu0 }
 0x20e   :  { %v977_v14 = vadd.f32 %v3955_v35, %v802_v12  ;;  %v804_v16 = vpop.f32.mrb[23].mxu0  ;;  %1573 = vmatpush1.bf16.msra.mxu1 %v3451_v4  ;;  %v1031_v19 = vmax.f32 %v975_v5, 0.0 }
 0x20f   :  { %v978_v13 = vadd.f32 %v3959_v36, %v804_v16  ;;  %1574 = vmatprep.subr.bf16.mxu1 %v3456_v8  ;;  %v4034_v18 = vpack.c.bf16 %v1163_v10, %v1155_v52  ;;  %v1032_v21 = vmax.f32 %v976_v11, 0.0 }
 0x210   :  { %v1033_v20 = vmax.f32 %v977_v14, 0.0 }
 0x211   :  { %v1034_v23 = vmax.f32 %v978_v13, 0.0 }
 0x212   :  { %v1169_v24 = vmax.f32 %v1031_v19, %v1033_v20  ;;  %1575 = vmatpush1.bf16.msra.mxu1 %v3454_v17 }
 0x213   :  { %v1170_v26 = vmax.f32 %v1032_v21, %v1034_v23  ;;  %v808_v27 = vpop.f32.mrb[24].mxu0  ;;  %1576 = vmatprep.subr.bf16.mxu1 %v3459_v15 }
 0x214   :  { %v979_v29 = vadd.f32 %v3955_v35, %v808_v27  ;;  %v810_v30 = vpop.f32.mrb[25].mxu0 }
 0x215   :  { %v1171_v33 = vmax.f32 %v1169_v24, %v1170_v26  ;;  %v980_v37 = vadd.f32 %v3959_v36, %v810_v30  ;;  %v812_v38 = vpop.f32.mrb[26].mxu0 }
 0x216   :  { %v981_v39 = vadd.f32 %v3955_v35, %v812_v38  ;;  %v814_v41 = vpop.f32.mrb[27].mxu0  ;;  %1577 = vmatpush1.bf16.msra.mxu1 %v3457_v25  ;;  %v1035_v44 = vmax.f32 %v979_v29, 0.0 }
 0x217   :  { %v982_v42 = vadd.f32 %v3959_v36, %v814_v41  ;;  %v1277_v43 = vpack.c.bf16 %v1171_v33, %v1163_v10  ;;  %1783 = vmatprep.subr.bf16.mxu1 %v3462_v28  ;;  %v1036_v46 = vmax.f32 %v980_v37, 0.0 }
 0x218   :  { %v1037_v45 = vmax.f32 %v981_v39, 0.0 }
 0x219   :  { %v1038_v47 = vmax.f32 %v982_v42, 0.0  ;;  %1432 = vmatmul.mubr.bf16.gmra.mrb[8].mxu1 %v1277_v43 }
 0x21a   :  { %v1177_v48 = vmax.f32 %v1035_v44, %v1037_v45  ;;  %1441 = vmatprep.mubr.bf16.mxu1 %v3594_v0 }
 0x21b   :  { %v1178_v49 = vmax.f32 %v1036_v46, %v1038_v47  ;;  %v818_v50 = vpop.f32.mrb[28].mxu0 }
 0x21c   :  { %v983_v51 = vadd.f32 %v3955_v35, %v818_v50  ;;  %v820_v52 = vpop.f32.mrb[29].mxu0 }
 0x21d   :  { %v1179_v53 = vmax.f32 %v1177_v48, %v1178_v49  ;;  %v984_v55 = vadd.f32 %v3959_v36, %v820_v52  ;;  %v822_v56 = vpop.f32.mrb[30].mxu0 }
 0x21e   :  { %v985_v57 = vadd.f32 %v3955_v35, %v822_v56  ;;  %v824_v58 = vpop.f32.mrb[31].mxu0  ;;  %v1039_v61 = vmax.f32 %v983_v51, 0.0 }
 0x21f   :  { %v986_v59 = vadd.f32 %v3959_v36, %v824_v58  ;;  %v4051_v60 = vpack.c.bf16 %v1179_v53, %v1171_v33  ;;  %v1040_v63 = vmax.f32 %v984_v55, 0.0 }
 0x220   :  { %v1041_v62 = vmax.f32 %v985_v57, 0.0 }
 0x221   :  { %v1042_v1 = vmax.f32 %v986_v59, 0.0 }
 0x222   :  { %v1185_v2 = vmax.f32 %v1039_v61, %v1041_v62 }
 0x223   :  { %v1186_v3 = vmax.f32 %v1040_v63, %v1042_v1  ;;  %v828_v4 = vpop.f32.mrb[32].mxu0 }
 0x224   :  { %v987_v6 = vadd.f32 %v3955_v35, %v828_v4  ;;  %v830_v7 = vpop.f32.mrb[33].mxu0 }
 0x225   :  { %v1187_v8 = vmax.f32 %v1185_v2, %v1186_v3  ;;  %v988_v5 = vadd.f32 %v3959_v36, %v830_v7  ;;  %v832_v9 = vpop.f32.mrb[34].mxu0 }
 0x226   :  { %v989_v10 = vadd.f32 %v3955_v35, %v832_v9  ;;  %v834_v11 = vpop.f32.mrb[35].mxu0  ;;  %v1043_v16 = vmax.f32 %v987_v6, 0.0 }
 0x227   :  { %v990_v12 = vadd.f32 %v3959_v36, %v834_v11  ;;  %v1278_v14 = vpack.c.bf16 %v1187_v8, %v1179_v53  ;;  %v1044_v13 = vmax.f32 %v988_v5, 0.0 }
 0x228   :  { %v1045_v17 = vmax.f32 %v989_v10, 0.0 }
 0x229   :  { %v1046_v15 = vmax.f32 %v990_v12, 0.0  ;;  %1442 = vmatmul.mubr.bf16.gmra.mrb[12].mxu1 %v1278_v14 }
 0x22a   :  { %v1193_v19 = vmax.f32 %v1043_v16, %v1045_v17  ;;  %1451 = vmatprep.mubr.bf16.mxu1 %v3594_v0 }
 0x22b   :  { %v1194_v20 = vmax.f32 %v1044_v13, %v1046_v15  ;;  %v838_v21 = vpop.f32.mrb[36].mxu0 }
 0x22c   :  { %v991_v23 = vadd.f32 %v3955_v35, %v838_v21  ;;  %v840_v24 = vpop.f32.mrb[37].mxu0 }
 0x22d   :  { %v1195_v25 = vmax.f32 %v1193_v19, %v1194_v20  ;;  %v992_v26 = vadd.f32 %v3959_v36, %v840_v24  ;;  %v842_v27 = vpop.f32.mrb[38].mxu0 }
 0x22e   :  { %v993_v28 = vadd.f32 %v3955_v35, %v842_v27  ;;  %v844_v29 = vpop.f32.mrb[39].mxu0  ;;  %v1047_v37 = vmax.f32 %v991_v23, 0.0 }
 0x22f   :  { %v994_v30 = vadd.f32 %v3959_v36, %v844_v29  ;;  %v4062_v33 = vpack.c.bf16 %v1195_v25, %v1187_v8  ;;  %v1048_v39 = vmax.f32 %v992_v26, 0.0 }
 0x230   :  { %v1049_v38 = vmax.f32 %v993_v28, 0.0 }
 0x231   :  { %v1050_v41 = vmax.f32 %v994_v30, 0.0 }
 0x232   :  { %v1201_v42 = vmax.f32 %v1047_v37, %v1049_v38 }
 0x233   :  { %v1202_v43 = vmax.f32 %v1048_v39, %v1050_v41  ;;  %v848_v44 = vpop.f32.mrb[40].mxu0 }
 0x234   :  { %v995_v45 = vadd.f32 %v3955_v35, %v848_v44  ;;  %v850_v46 = vpop.f32.mrb[41].mxu0 }
 0x235   :  { %v1203_v47 = vmax.f32 %v1201_v42, %v1202_v43  ;;  %v996_v48 = vadd.f32 %v3959_v36, %v850_v46  ;;  %v852_v49 = vpop.f32.mrb[42].mxu0 }
 0x236   :  { %v997_v50 = vadd.f32 %v3955_v35, %v852_v49  ;;  %v854_v51 = vpop.f32.mrb[43].mxu0  ;;  %v1051_v55 = vmax.f32 %v995_v45, 0.0 }
 0x237   :  { %v998_v52 = vadd.f32 %v3959_v36, %v854_v51  ;;  %v1279_v53 = vpack.c.bf16 %v1203_v47, %v1195_v25  ;;  %v1052_v57 = vmax.f32 %v996_v48, 0.0 }
 0x238   :  { %v1053_v56 = vmax.f32 %v997_v50, 0.0 }
 0x239   :  { %v1054_v58 = vmax.f32 %v998_v52, 0.0  ;;  %1452 = vmatmul.mubr.bf16.gmra.mrb[16].mxu1 %v1279_v53 }
 0x23a   :  { %v1209_v59 = vmax.f32 %v1051_v55, %v1053_v56  ;;  %1461 = vmatprep.mubr.bf16.mxu1 %v3594_v0 }
 0x23b   :  { %v1210_v61 = vmax.f32 %v1052_v57, %v1054_v58  ;;  %v858_v62 = vpop.f32.mrb[44].mxu0 }
 0x23c   :  { %v999_v63 = vadd.f32 %v3955_v35, %v858_v62  ;;  %v860_v1 = vpop.f32.mrb[45].mxu0  ;;  %v3468_v62 = vld [vmem:[%s4301_s3 + $0x124] ss:$8 sps:$4 sm:$0xff]  }
 0x23d   :  { %v1211_v2 = vmax.f32 %v1209_v59, %v1210_v61  ;;  %v1000_v3 = vadd.f32 %v3959_v36, %v860_v1  ;;  %v862_v4 = vpop.f32.mrb[46].mxu0  ;;  %v3465_v59 = vld [vmem:[%s4301_s3 + $0x114] ss:$8 sps:$4 sm:$0xff]   ;;  %v3463_v61 = vld [vmem:[%s4301_s3 + $0x110] ss:$8 sps:$4 sm:$0xff]  }
 0x23e   :  { %v1001_v6 = vadd.f32 %v3955_v35, %v862_v4  ;;  %v864_v7 = vpop.f32.mrb[47].mxu0  ;;  %v1055_v9 = vmax.f32 %v999_v63, 0.0  ;;  %v3471_v63 = vld [vmem:[%s4301_s3 + $0x134] ss:$8 sps:$4 sm:$0xff]   ;;  %v3469_v1 = vld [vmem:[%s4301_s3 + $0x130] ss:$8 sps:$4 sm:$0xff]  }
 0x23f   :  { %v1002_v8 = vadd.f32 %v3959_v36, %v864_v7  ;;  %v4073_v5 = vpack.c.bf16 %v1211_v2, %v1203_v47  ;;  %v1056_v11 = vmax.f32 %v1000_v3, 0.0  ;;  %v3472_v3 = vld [vmem:[%s4301_s3 + $0x140] ss:$8 sps:$4 sm:$0xff]   ;;  %v3477_v4 = vld [vmem:[%s4301_s3 + $0x154] ss:$8 sps:$4 sm:$0xff]  }
 0x240   :  { %v1057_v10 = vmax.f32 %v1001_v6, 0.0  ;;  %v3475_v6 = vld [vmem:[%s4301_s3 + $0x150] ss:$8 sps:$4 sm:$0xff]   ;;  %v3480_v7 = vld [vmem:[%s4301_s3 + $0x164] ss:$8 sps:$4 sm:$0xff]  }
 0x241   :  { %v1058_v12 = vmax.f32 %v1002_v8, 0.0  ;;  %v3478_v8 = vld [vmem:[%s4301_s3 + $0x160] ss:$8 sps:$4 sm:$0xff]  }
 0x242   :  { %v1217_v14 = vmax.f32 %v1055_v9, %v1057_v10  ;;  %v3483_v9 = vld [vmem:[%s4301_s3 + $0x174] ss:$8 sps:$4 sm:$0xff]   ;;  %v3481_v10 = vld [vmem:[%s4301_s3 + $0x170] ss:$8 sps:$4 sm:$0xff]  }
 0x243   :  { %v1218_v16 = vmax.f32 %v1056_v11, %v1058_v12  ;;  %v868_v17 = vpop.f32.mrb[48].mxu0  ;;  %v3484_v11 = vld [vmem:[#allocation7 + $0x40] sm:$0xff]   ;;  %v3485_v12 = vld [vmem:[#allocation7 + $0x48] sm:$0xff]  }
 0x244   :  { %v1003_v13 = vadd.f32 %v3955_v35, %v868_v17  ;;  %v870_v15 = vpop.f32.mrb[49].mxu0  ;;  %v3490_v17 = vld [vmem:[#allocation7 + $0x70] sm:$0xff]  }
 0x245   :  { %v1219_v19 = vmax.f32 %v1217_v14, %v1218_v16  ;;  %v1004_v20 = vadd.f32 %v3959_v36, %v870_v15  ;;  %v872_v21 = vpop.f32.mrb[50].mxu0  ;;  %v3486_v14 = vld [vmem:[#allocation7 + $0x50] sm:$0xff]   ;;  %v3487_v16 = vld [vmem:[#allocation7 + $0x58] sm:$0xff]  }
 0x246   :  { %v1005_v23 = vadd.f32 %v3955_v35, %v872_v21  ;;  %v874_v24 = vpop.f32.mrb[51].mxu0  ;;  %v1059_v27 = vmax.f32 %v1003_v13, 0.0  ;;  %v3497_v13 = vld [vmem:[#allocation7 + $0x150] sm:$0xff]   ;;  %v3499_v15 = vld [vmem:[#allocation7 + $0x158] sm:$0xff]  }
 0x247   :  { %v1006_v25 = vadd.f32 %v3959_v36, %v874_v24  ;;  %v1280_v26 = vpack.c.bf16 %v1219_v19, %v1211_v2  ;;  %v1060_v29 = vmax.f32 %v1004_v20, 0.0  ;;  %v3474_v2 = vld [vmem:[%s4301_s3 + $0x144] ss:$8 sps:$4 sm:$0xff]   ;;  %v3505_v21 = vld [vmem:[#allocation7 + $0x170] sm:$0xff]   ;;  %v1914_v24 = vld [vmem:[%s4302_s4] sm:$0x3] }
 0x248   :  { %v1061_v28 = vmax.f32 %v1005_v23, 0.0  ;;  %v3503_v20 = vld [vmem:[#allocation7 + $0x168] sm:$0xff]   ;;  %v3507_v23 = vld [vmem:[#allocation7 + $0x178] sm:$0xff]  }
 0x249   :  { %v1062_v30 = vmax.f32 %v1006_v25, 0.0  ;;  %1462 = vmatmul.mubr.bf16.gmra.mrb[20].mxu1 %v1280_v26  ;;  %v4189_v25 = vrot.slane %v1914_v24, %v947_v32  ;;  %v4193_v26 = vrot.slane %v1914_v24, %v951_v34 }
 0x24a   :  { %v1225_v37 = vmax.f32 %v1059_v27, %v1061_v28  ;;  %1471 = vmatprep.mubr.bf16.mxu1 %v3594_v0 }
 0x24b   :  { %v1226_v38 = vmax.f32 %v1060_v29, %v1062_v30  ;;  %v878_v39 = vpop.f32.mrb[52].mxu0 }
 0x24c   :  { %v1007_v41 = vadd.f32 %v3955_v35, %v878_v39  ;;  %v880_v42 = vpop.f32.mrb[53].mxu0 }
 0x24d   :  { %v1227_v43 = vmax.f32 %v1225_v37, %v1226_v38  ;;  %v1008_v44 = vadd.f32 %v3959_v36, %v880_v42  ;;  %v882_v45 = vpop.f32.mrb[54].mxu0 }
 0x24e   :  { %v1009_v46 = vadd.f32 %v3955_v35, %v882_v45  ;;  %v884_v47 = vpop.f32.mrb[55].mxu0  ;;  %v1063_v50 = vmax.f32 %v1007_v41, 0.0  ;;  %v3460_v35 = vld [vmem:[%s4301_s3 + $0x100] ss:$8 sps:$4 sm:$0xff]  }
 0x24f   :  { %v1010_v48 = vadd.f32 %v3959_v36, %v884_v47  ;;  %v4084_v49 = vpack.c.bf16 %v1227_v43, %v1219_v19  ;;  %v1064_v52 = vmax.f32 %v1008_v44, 0.0  ;;  %v1251_v36 = vpack.c.bf16 %v3966_v54, %v3595_v22  ;;  %v3466_v54 = vld [vmem:[%s4301_s3 + $0x120] ss:$8 sps:$4 sm:$0xff]  }
 0x250   :  { %v1065_v51 = vmax.f32 %v1009_v46, 0.0  ;;  %v3501_v19 = vld [vmem:[#allocation7 + $0x160] sm:$0xff]  }
 0x251   :  { %v1066_v53 = vmax.f32 %v1010_v48, 0.0 }
 0x252   :  { %v1233_v55 = vmax.f32 %v1063_v50, %v1065_v51 }
 0x253   :  { %v1234_v56 = vmax.f32 %v1064_v52, %v1066_v53 }
 0x255   :  { %v4086_v57 = vmax.f32 %v1233_v55, %v1234_v56 }
 0x257   :  { %v1281_v58 = vpack.c.bf16 %v4086_v57, %v1227_v43 }
 0x259   :  { %1472 = vmatmul.mubr.bf16.gmra.mrb[24].mxu1 %v1281_v58 }
 0x25a   :  { %1594 = vmatprep.mubr.bf16.mxu1 %v3594_v0 }
 0x261   :  { %1595 = vmatmul.mubr.bf16.vlgmr.msra.gmra.mrb[0].mxu1 %v1251_v36 }
 0x262   :  { %1784 = vmatpush1.bf16.msra.mxu1 %v3460_v35  ;;  %1604 = vmatprep.mubr.bf16.mxu1 %v3594_v0 }
 0x263   :  { %1785 = vmatprep.subr.bf16.mxu1 %v3465_v59 }
 0x266   :  { %1786 = vmatpush1.bf16.msra.mxu1 %v3463_v61 }
 0x267   :  { %1787 = vmatprep.subr.bf16.mxu1 %v3468_v62 }
 0x269   :  { %1605 = vmatmul.mubr.bf16.gmra.mrb[4].mxu1 %v3999_v40 }
 0x26a   :  { %1614 = vmatprep.mubr.bf16.mxu1 %v3594_v0  ;;  %1788 = vmatpush1.bf16.msra.mxu1 %v3466_v54 }
 0x26b   :  { %1789 = vmatprep.subr.bf16.mxu1 %v3471_v63 }
 0x26e   :  { %1790 = vmatpush1.bf16.msra.mxu1 %v3469_v1 }
 0x26f   :  { %1791 = vmatprep.subr.bf16.mxu1 %v3474_v2 }
 0x271   :  { %1615 = vmatmul.mubr.bf16.gmra.mrb[8].mxu1 %v4034_v18 }
 0x272   :  { %1624 = vmatprep.mubr.bf16.mxu1 %v3594_v0  ;;  %1792 = vmatpush1.bf16.msra.mxu1 %v3472_v3 }
 0x273   :  { %1793 = vmatprep.subr.bf16.mxu1 %v3477_v4  ;;  %v3492_v4 = vld [vmem:[#allocation7] sm:$0xff]  }
 0x276   :  { %1794 = vmatpush1.bf16.msra.mxu1 %v3475_v6 }
 0x277   :  { %1795 = vmatprep.subr.bf16.mxu1 %v3480_v7 }
 0x279   :  { %1625 = vmatmul.mubr.bf16.gmra.mrb[12].mxu1 %v4051_v60 }
 0x27a   :  { %1634 = vmatprep.mubr.bf16.mxu1 %v3594_v0  ;;  %1796 = vmatpush1.bf16.msra.mxu1 %v3478_v8 }
 0x27b   :  { %1797 = vmatprep.subr.bf16.mxu1 %v3483_v9 }
 0x27e   :  { %1798 = vmatpush1.bf16.msra.mxu1 %v3481_v10 }
 0x27f   :  { %3077 = vmatprep.subr.bf16.mxu1 %v3595_v22 }
 0x281   :  { %1635 = vmatmul.mubr.bf16.gmra.mrb[16].mxu1 %v4062_v33 }
 0x282   :  { %1644 = vmatprep.mubr.bf16.mxu1 %v3594_v0 }
 0x289   :  { %1645 = vmatmul.mubr.bf16.gmra.mrb[20].mxu1 %v4073_v5 }
 0x28a   :  { %1654 = vmatprep.mubr.bf16.mxu1 %v3594_v0 }
 0x291   :  { %1655 = vmatmul.mubr.bf16.gmra.mrb[24].mxu1 %v4084_v49 }
 0x292   :  { %1815 = vmatprep.mubr.bf16.mxu1 %v3594_v0 }
 0x299   :  { %1816 = vmatmul.mubr.bf16.vlgmr.msra.gmra.mrb[0].mxu1 %v3999_v40  ;;  %v3488_v40 = vld [vmem:[#allocation7 + $0x60] sm:$0xff]  }
 0x29a   :  { %1825 = vmatprep.mubr.bf16.mxu1 %v3594_v0  ;;  %3078 = vmatpush3.bf16.msra.mxu1 %v3484_v11 }
 0x29b   :  { %3079 = vmatprep.subr.bf16.mxu1 %v3595_v22 }
 0x29e   :  { %3080 = vmatpush3.bf16.msra.mxu1 %v3485_v12 }
 0x29f   :  { %3081 = vmatprep.subr.bf16.mxu1 %v3595_v22 }
 0x2a1   :  { %1826 = vmatmul.mubr.bf16.gmra.mrb[4].mxu1 %v4034_v18  ;;  %v1685_v18 = vpack.c.bf16 %v3595_v22, %v4086_v57 }
 0x2a2   :  { %1835 = vmatprep.mubr.bf16.mxu1 %v3594_v0  ;;  %3082 = vmatpush3.bf16.msra.mxu1 %v3486_v14  ;;  %v3494_v14 = vld [vmem:[#allocation7 + $0x8] sm:$0xff]  }
 0x2a3   :  { %3083 = vmatprep.subr.bf16.mxu1 %v3595_v22 }
 0x2a6   :  { %3084 = vmatpush3.bf16.msra.mxu1 %v3487_v16 }
 0x2a7   :  { %3085 = vmatprep.subr.bf16.mxu1 %v3595_v22 }
 0x2a9   :  { %1836 = vmatmul.mubr.bf16.gmra.mrb[8].mxu1 %v4051_v60  ;;  %v3489_v60 = vld [vmem:[#allocation7 + $0x68] sm:$0xff]  }
 0x2aa   :  { %1845 = vmatprep.mubr.bf16.mxu1 %v3594_v0  ;;  %3086 = vmatpush3.bf16.msra.mxu1 %v3488_v40 }
 0x2ab   :  { %3087 = vmatprep.subr.bf16.mxu1 %v3595_v22 }
 0x2ae   :  { %3088 = vmatpush3.bf16.msra.mxu1 %v3489_v60 }
 0x2af   :  { %3089 = vmatprep.subr.bf16.mxu1 %v3595_v22 }
 0x2b1   :  { %1846 = vmatmul.mubr.bf16.gmra.mrb[12].mxu1 %v4062_v33  ;;  %v3491_v33 = vld [vmem:[#allocation7 + $0x78] sm:$0xff]  }
 0x2b2   :  { %1855 = vmatprep.mubr.bf16.mxu1 %v3594_v0  ;;  %3090 = vmatpush3.bf16.msra.mxu1 %v3490_v17 }
 0x2b3   :  { %3091 = vmatprep.subr.bf16.mxu1 %v3595_v22 }
 0x2b6   :  { %3092 = vmatpush3.bf16.msra.mxu1 %v3491_v33 }
 0x2b7   :  { %3097 = vmatprep.subr.bf16.mxu1 %v3595_v22 }
 0x2b9   :  { %1856 = vmatmul.mubr.bf16.gmra.mrb[16].mxu1 %v4073_v5  ;;  %v3495_v5 = vld [vmem:[#allocation7 + $0x148] sm:$0xff]  }
 0x2ba   :  { %1865 = vmatprep.mubr.bf16.mxu1 %v3594_v0 }
 0x2c1   :  { %1866 = vmatmul.mubr.bf16.gmra.mrb[20].mxu1 %v4084_v49 }
 0x2c2   :  { %1875 = vmatprep.mubr.bf16.mxu1 %v3594_v0  ;;  %v3493_v0 = vld [vmem:[#allocation7 + $0x140] sm:$0xff]  }
 0x2c3   :  { %3178 = vmatpush3.bf16.msra.mxu0 %v3493_v0 }
 0x2c4   :  { %3179 = vmatprep.subr.bf16.mxu0 %v3595_v22 }
 0x2c7   :  { %3180 = vmatpush3.bf16.msra.mxu0 %v3495_v5 }
 0x2c8   :  { %3181 = vmatprep.subr.bf16.mxu0 %v3595_v22 }
 0x2c9   :  { %1876 = vmatmul.mubr.bf16.gmra.mrb[24].mxu1 %v1685_v18 }
 0x2ca   :  { %3093 = vmatprep.mubr.msk.bf16.mxu1 %vm3596_vm2, %v3595_v22 }
 0x2cb   :  { %3182 = vmatpush3.bf16.msra.mxu0 %v3497_v13 }
 0x2cc   :  { %3183 = vmatprep.subr.bf16.mxu0 %v3595_v22 }
 0x2cf   :  { %3184 = vmatpush3.bf16.msra.mxu0 %v3499_v15  ;;  %v3496_v15 = vld [vmem:[#allocation7 + $0x10] sm:$0xff]  }
 0x2d0   :  { %3185 = vmatprep.subr.bf16.mxu0 %v3595_v22 }
 0x2d3   :  { %3186 = vmatpush3.bf16.msra.mxu0 %v3501_v19 }
 0x2d4   :  { %3187 = vmatprep.subr.bf16.mxu0 %v3595_v22 }
 0x2d7   :  { %3188 = vmatpush3.bf16.msra.mxu0 %v3503_v20 }
 0x2d8   :  { %3189 = vmatprep.subr.bf16.mxu0 %v3595_v22 }
 0x2db   :  { %3190 = vmatpush3.bf16.msra.mxu0 %v3505_v21 }
 0x2dc   :  { %3191 = vmatprep.subr.bf16.mxu0 %v3595_v22 }
 0x2df   :  { %3192 = vmatpush3.bf16.msra.mxu0 %v3507_v23 }
 0x36c   :  { %v1817_v27 = vpop.f32.mrb[0].mxu1 }
 0x36d   :  { %v1926_v28 = vadd.f32 %v4189_v25, %v1817_v27  ;;  %v1819_v29 = vpop.f32.mrb[1].mxu1 }
 0x36e   :  { %v1927_v30 = vadd.f32 %v4193_v26, %v1819_v29  ;;  %v1821_v37 = vpop.f32.mrb[2].mxu1 }
 0x36f   :  { %v1928_v38 = vadd.f32 %v4189_v25, %v1821_v37  ;;  %v1823_v39 = vpop.f32.mrb[3].mxu1  ;;  %v1954_v42 = vmax.f32 %v1926_v28, 0.0  ;;  %v3498_v28 = vld [vmem:[#allocation7 + $0x18] sm:$0xff]  }
 0x370   :  { %v1929_v41 = vadd.f32 %v4193_v26, %v1823_v39  ;;  %v1955_v32 = vmax.f32 %v1927_v30, 0.0 }
 0x371   :  { %v1956_v43 = vmax.f32 %v1928_v38, 0.0 }
 0x372   :  { %v1957_v44 = vmax.f32 %v1929_v41, 0.0 }
 0x373   :  { %v2014_v45 = vmax.f32 %v1954_v42, %v1956_v43 }
 0x374   :  { %v2015_v31 = vmax.f32 %v1955_v32, %v1957_v44  ;;  %v1827_v34 = vpop.f32.mrb[4].mxu1  ;;  %v3500_v44 = vld [vmem:[#allocation7 + $0x20] sm:$0xff]  }
 0x375   :  { %v1930_v46 = vadd.f32 %v4189_v25, %v1827_v34  ;;  %v1829_v47 = vpop.f32.mrb[5].mxu1 }
 0x376   :  { %v4200_v48 = vmax.f32 %v2014_v45, %v2015_v31  ;;  %v1931_v49 = vadd.f32 %v4193_v26, %v1829_v47  ;;  %v1831_v50 = vpop.f32.mrb[6].mxu1 }
 0x377   :  { %v1932_v51 = vadd.f32 %v4189_v25, %v1831_v50  ;;  %v1833_v52 = vpop.f32.mrb[7].mxu1  ;;  %v1958_v55 = vmax.f32 %v1930_v46, 0.0  ;;  %v3502_v50 = vld [vmem:[#allocation7 + $0x28] sm:$0xff]  }
 0x378   :  { %v1933_v53 = vadd.f32 %v4193_v26, %v1833_v52  ;;  %v1959_v57 = vmax.f32 %v1931_v49, 0.0 }
 0x379   :  { %v1960_v56 = vmax.f32 %v1932_v51, 0.0 }
 0x37a   :  { %v1961_v58 = vmax.f32 %v1933_v53, 0.0 }
 0x37b   :  { %v2038_v35 = vmax.f32 %v1958_v55, %v1960_v56 }
 0x37c   :  { %v2039_v36 = vmax.f32 %v1959_v57, %v1961_v58  ;;  %v1837_v59 = vpop.f32.mrb[8].mxu1 }
 0x37d   :  { %v1934_v61 = vadd.f32 %v4189_v25, %v1837_v59  ;;  %v1839_v62 = vpop.f32.mrb[9].mxu1  ;;  %v3504_v59 = vld [vmem:[#allocation7 + $0x30] sm:$0xff]  }
 0x37e   :  { %v2040_v54 = vmax.f32 %v2038_v35, %v2039_v36  ;;  %v1935_v63 = vadd.f32 %v4193_v26, %v1839_v62  ;;  %v1841_v1 = vpop.f32.mrb[10].mxu1 }
 0x37f   :  { %v1936_v2 = vadd.f32 %v4189_v25, %v1841_v1  ;;  %v1843_v3 = vpop.f32.mrb[11].mxu1  ;;  %v1962_v8 = vmax.f32 %v1934_v61, 0.0 }
 0x380   :  { %v2041_v6 = vpack.c.bf16 %v2040_v54, %v2040_v54  ;;  %v1937_v7 = vadd.f32 %v4193_v26, %v1843_v3  ;;  %v1963_v10 = vmax.f32 %v1935_v63, 0.0  ;;  %v3506_v3 = vld [vmem:[#allocation7 + $0x38] sm:$0xff]  }
 0x381   :  { %v1964_v9 = vmax.f32 %v1936_v2, 0.0 }
 0x382   :  { %v1965_v11 = vmax.f32 %v1937_v7, 0.0  ;;  %3094 = vmatmul.mubr.bf16.vlgmr.msra.gmra.mrb[28].mxu1 %v2041_v6 }
 0x383   :  { %v2239_v12 = vmax.f32 %v1962_v8, %v1964_v9  ;;  %3098 = vmatpush3.bf16.msra.mxu1 %v3492_v4  ;;  %3113 = vmatprep.mubr.msk.bf16.mxu1 %vm3596_vm2, %v3595_v22 }
 0x384   :  { %v2240_v16 = vmax.f32 %v1963_v10, %v1965_v11  ;;  %v1847_v40 = vpop.f32.mrb[12].mxu1  ;;  %3099 = vmatprep.subr.bf16.mxu1 %v3595_v22 }
 0x385   :  { %v1938_v18 = vadd.f32 %v4189_v25, %v1847_v40  ;;  %v1849_v60 = vpop.f32.mrb[13].mxu1  ;;  %v2017_v40 = vpack.c.bf16 %v4200_v48, %v4200_v48 }
 0x386   :  { %v4213_v17 = vmax.f32 %v2239_v12, %v2240_v16  ;;  %v1939_v33 = vadd.f32 %v4193_v26, %v1849_v60  ;;  %v1851_v0 = vpop.f32.mrb[14].mxu1  ;;  %v3508_v16 = vld [vmem:[#allocation7 + $0x80] sm:$0xff]  }
 0x387   :  { %v1940_v5 = vadd.f32 %v4189_v25, %v1851_v0  ;;  %3100 = vmatpush3.bf16.msra.mxu1 %v3494_v14  ;;  %v1853_v13 = vpop.f32.mrb[15].mxu1  ;;  %v1966_v20 = vmax.f32 %v1938_v18, 0.0 }
 0x388   :  { %v1941_v19 = vadd.f32 %v4193_v26, %v1853_v13  ;;  %3101 = vmatprep.subr.bf16.mxu1 %v3595_v22  ;;  %v1967_v23 = vmax.f32 %v1939_v33, 0.0 }
 0x389   :  { %v1968_v21 = vmax.f32 %v1940_v5, 0.0 }
 0x38a   :  { %v1969_v24 = vmax.f32 %v1941_v19, 0.0 }
 0x38b   :  { %v2353_v27 = vmax.f32 %v1966_v20, %v1968_v21  ;;  %3102 = vmatpush3.bf16.msra.mxu1 %v3496_v15  ;;  %v3511_v20 = vld [vmem:[#allocation7 + $0x98] sm:$0xff]   ;;  %v3512_v21 = vld [vmem:[#allocation7 + $0xa0] sm:$0xff]  }
 0x38c   :  { %v2354_v29 = vmax.f32 %v1967_v23, %v1969_v24  ;;  %v1857_v30 = vpop.f32.mrb[16].mxu1  ;;  %3103 = vmatprep.subr.bf16.mxu1 %v3595_v22  ;;  %v3513_v23 = vld [vmem:[#allocation7 + $0xa8] sm:$0xff]   ;;  %v3514_v24 = vld [vmem:[#allocation7 + $0xb0] sm:$0xff]  }
 0x38d   :  { %v1942_v37 = vadd.f32 %v4189_v25, %v1857_v30  ;;  %v1859_v38 = vpop.f32.mrb[17].mxu1  ;;  %v3517_v30 = vld [vmem:[#allocation7 + $0xc8] sm:$0xff]  }
 0x38e   :  { %v4221_v39 = vmax.f32 %v2353_v27, %v2354_v29  ;;  %v1943_v41 = vadd.f32 %v4193_v26, %v1859_v38  ;;  %v1861_v42 = vpop.f32.mrb[18].mxu1  ;;  %v3515_v27 = vld [vmem:[#allocation7 + $0xb8] sm:$0xff]   ;;  %v2242_v29 = vpack.c.bf16 %v4213_v17, %v4213_v17  ;;  %v3520_v17 = vld [vmem:[#allocation7 + $0xe0] sm:$0xff]  }
 0x38f   :  { %v1944_v43 = vadd.f32 %v4189_v25, %v1861_v42  ;;  %3104 = vmatpush3.bf16.msra.mxu1 %v3498_v28  ;;  %v1863_v32 = vpop.f32.mrb[19].mxu1  ;;  %v1970_v31 = vmax.f32 %v1942_v37, 0.0  ;;  %v3516_v28 = vld [vmem:[#allocation7 + $0xc0] sm:$0xff]   ;;  %v3518_v37 = vld [vmem:[#allocation7 + $0xd0] sm:$0xff]   ;;  %v3519_v38 = vld [vmem:[#allocation7 + $0xd8] sm:$0xff]  }
 0x390   :  { %v1945_v45 = vadd.f32 %v4193_v26, %v1863_v32  ;;  %3105 = vmatprep.subr.bf16.mxu1 %v3595_v22  ;;  %v1971_v46 = vmax.f32 %v1943_v41, 0.0  ;;  %v3521_v41 = vld [vmem:[#allocation7 + $0xe8] sm:$0xff]   ;;  %v3522_v42 = vld [vmem:[#allocation7 + $0xf0] sm:$0xff]   ;;  %v3524_v32 = vld [vmem:[#allocation7 + $0x100] sm:$0xff]  }
 0x391   :  { %v1972_v34 = vmax.f32 %v1944_v43, 0.0  ;;  %v3523_v43 = vld [vmem:[#allocation7 + $0xf8] sm:$0xff]  }
 0x392   :  { %v1973_v47 = vmax.f32 %v1945_v45, 0.0  ;;  %v3525_v45 = vld [vmem:[#allocation7 + $0x108] sm:$0xff]  }
 0x393   :  { %v2467_v49 = vmax.f32 %v1970_v31, %v1972_v34  ;;  %3106 = vmatpush3.bf16.msra.mxu1 %v3500_v44  ;;  %v2356_v44 = vpack.c.bf16 %v4221_v39, %v4221_v39  ;;  %v3526_v31 = vld [vmem:[#allocation7 + $0x110] sm:$0xff]   ;;  %v3527_v34 = vld [vmem:[#allocation7 + $0x118] sm:$0xff]   ;;  %v3528_v39 = vld [vmem:[#allocation7 + $0x120] sm:$0xff]  }
 0x394   :  { %v2468_v51 = vmax.f32 %v1971_v46, %v1973_v47  ;;  %v1867_v52 = vpop.f32.mrb[20].mxu1  ;;  %3107 = vmatprep.subr.bf16.mxu1 %v3595_v22  ;;  %v3529_v46 = vld [vmem:[#allocation7 + $0x128] sm:$0xff]   ;;  %v3530_v47 = vld [vmem:[#allocation7 + $0x130] sm:$0xff]  }
 0x395   :  { %v1946_v53 = vadd.f32 %v4189_v25, %v1867_v52  ;;  %v1869_v55 = vpop.f32.mrb[21].mxu1  ;;  %v3533_v52 = vld [vmem:[#allocation7 + $0x188] sm:$0xff]  }
 0x396   :  { %v4229_v56 = vmax.f32 %v2467_v49, %v2468_v51  ;;  %v1947_v57 = vadd.f32 %v4193_v26, %v1869_v55  ;;  %v1871_v58 = vpop.f32.mrb[22].mxu1  ;;  %v3531_v49 = vld [vmem:[#allocation7 + $0x138] sm:$0xff]  }
 0x397   :  { %v1948_v35 = vadd.f32 %v4189_v25, %v1871_v58  ;;  %3108 = vmatpush3.bf16.msra.mxu1 %v3502_v50  ;;  %v1873_v36 = vpop.f32.mrb[23].mxu1  ;;  %v1974_v62 = vmax.f32 %v1946_v53, 0.0  ;;  %v3532_v50 = vld [vmem:[#allocation7 + $0x180] sm:$0xff]   ;;  %v3534_v53 = vld [vmem:[#allocation7 + $0x190] sm:$0xff]   ;;  %v3535_v55 = vld [vmem:[#allocation7 + $0x198] sm:$0xff]  }
 0x398   :  { %v1949_v61 = vadd.f32 %v4193_v26, %v1873_v36  ;;  %3109 = vmatprep.subr.bf16.mxu1 %v3595_v22  ;;  %v1975_v63 = vmax.f32 %v1947_v57, 0.0  ;;  %v2470_v51 = vpack.c.bf16 %v4229_v56, %v4229_v56  ;;  %v3536_v56 = vld [vmem:[#allocation7 + $0x1a0] sm:$0xff]   ;;  %v3537_v57 = vld [vmem:[#allocation7 + $0x1a8] sm:$0xff]   ;;  %v3538_v58 = vld [vmem:[#allocation7 + $0x1b0] sm:$0xff]  }
 0x399   :  { %v1976_v54 = vmax.f32 %v1948_v35, 0.0  ;;  %v3539_v35 = vld [vmem:[#allocation7 + $0x1b8] sm:$0xff]  }
 0x39a   :  { %v1977_v1 = vmax.f32 %v1949_v61, 0.0 }
 0x39b   :  { %v2581_v2 = vmax.f32 %v1974_v62, %v1976_v54  ;;  %3110 = vmatpush3.bf16.msra.mxu1 %v3504_v59 }
 0x39c   :  { %v2582_v4 = vmax.f32 %v1975_v63, %v1977_v1  ;;  %v1877_v6 = vpop.f32.mrb[24].mxu1  ;;  %3111 = vmatprep.subr.bf16.mxu1 %v3595_v22 }
 0x39d   :  { %v1950_v7 = vadd.f32 %v4189_v25, %v1877_v6  ;;  %v1879_v8 = vpop.f32.mrb[25].mxu1 }
 0x39e   :  { %v2583_v9 = vmax.f32 %v2581_v2, %v2582_v4  ;;  %v1951_v10 = vadd.f32 %v4193_v26, %v1879_v8  ;;  %v1881_v11 = vpop.f32.mrb[26].mxu1 }
 0x39f   :  { %v1952_v12 = vadd.f32 %v4189_v25, %v1881_v11  ;;  %3112 = vmatpush3.bf16.msra.mxu1 %v3506_v3  ;;  %v1883_v14 = vpop.f32.mrb[27].mxu1  ;;  %v1978_v33 = vmax.f32 %v1950_v7, 0.0  ;;  %v3509_v25 = vld [vmem:[#allocation7 + $0x88] sm:$0xff]  }
 0x3a0   :  { %v2584_v18 = vpack.c.bf16 %v2583_v9, %v2583_v9  ;;  %v1953_v60 = vadd.f32 %v4193_v26, %v1883_v14  ;;  %3117 = vmatprep.subr.bf16.mxu1 %v3595_v22  ;;  %v1979_v5 = vmax.f32 %v1951_v10, 0.0  ;;  %v3510_v26 = vld [vmem:[#allocation7 + $0x90] sm:$0xff]  }
 0x3a1   :  { %v1980_v0 = vmax.f32 %v1952_v12, 0.0 }
 0x3a2   :  { %v1981_v13 = vmax.f32 %v1953_v60, 0.0  ;;  %3114 = vmatmul.mubr.bf16.vlgmr.msra.gmra.mrb[32].mxu1 %v2017_v40  ;;  %3194 = vmatmul.mubr.bf16.vlgmr.msra.gmra.mrb[56].mxu0 %v2584_v18 }
 0x3a3   :  { %v2695_v15 = vmax.f32 %v1978_v33, %v1980_v0  ;;  %3118 = vmatpush3.bf16.msra.mxu1 %v3508_v16  ;;  %3133 = vmatprep.mubr.msk.bf16.mxu1 %vm3596_vm2, %v3595_v22 }
 0x3a4   :  { %v2696_v19 = vmax.f32 %v1979_v5, %v1981_v13  ;;  %3119 = vmatprep.subr.bf16.mxu1 %v3595_v22 }
 0x3a6   :  { %v4246_v48 = vmax.f32 %v2695_v15, %v2696_v19 }
 0x3a7   :  { %3120 = vmatpush3.bf16.msra.mxu1 %v3509_v25 }
 0x3a8   :  { %3121 = vmatprep.subr.bf16.mxu1 %v3595_v22  ;;  %v2698_v36 = vpack.c.bf16 %v4246_v48, %v4246_v48 }
 0x3ab   :  { %3122 = vmatpush3.bf16.msra.mxu1 %v3510_v26  ;;  %v3013_v26 = vld [vmem:[%s4304_s6] ss:$0 sm:$0xff] }
 0x3ac   :  { %3123 = vmatprep.subr.bf16.mxu1 %v3595_v22 }
 0x3af   :  { %3124 = vmatpush3.bf16.msra.mxu1 %v3511_v20 }
 0x3b0   :  { %3125 = vmatprep.subr.bf16.mxu1 %v3595_v22 }
 0x3b3   :  { %3126 = vmatpush3.bf16.msra.mxu1 %v3512_v21 }
 0x3b4   :  { %3127 = vmatprep.subr.bf16.mxu1 %v3595_v22 }
 0x3b7   :  { %3128 = vmatpush3.bf16.msra.mxu1 %v3513_v23 }
 0x3b8   :  { %3129 = vmatprep.subr.bf16.mxu1 %v3595_v22 }
 0x3bb   :  { %3130 = vmatpush3.bf16.msra.mxu1 %v3514_v24 }
 0x3bc   :  { %3131 = vmatprep.subr.bf16.mxu1 %v3595_v22 }
 0x3bf   :  { %3132 = vmatpush3.bf16.msra.mxu1 %v3515_v27 }
 0x3c0   :  { %3137 = vmatprep.subr.bf16.mxu1 %v3595_v22 }
 0x3c2   :  { %3134 = vmatmul.mubr.bf16.vlgmr.msra.gmra.mrb[36].mxu1 %v2242_v29 }
 0x3c3   :  { %3138 = vmatpush3.bf16.msra.mxu1 %v3516_v28  ;;  %3153 = vmatprep.mubr.msk.bf16.mxu1 %vm3596_vm2, %v3595_v22 }
 0x3c4   :  { %3139 = vmatprep.subr.bf16.mxu1 %v3595_v22 }
 0x3c7   :  { %3140 = vmatpush3.bf16.msra.mxu1 %v3517_v30 }
 0x3c8   :  { %3141 = vmatprep.subr.bf16.mxu1 %v3595_v22 }
 0x3cb   :  { %3142 = vmatpush3.bf16.msra.mxu1 %v3518_v37 }
 0x3cc   :  { %3143 = vmatprep.subr.bf16.mxu1 %v3595_v22 }
 0x3cf   :  { %3144 = vmatpush3.bf16.msra.mxu1 %v3519_v38 }
 0x3d0   :  { %3145 = vmatprep.subr.bf16.mxu1 %v3595_v22 }
 0x3d3   :  { %3146 = vmatpush3.bf16.msra.mxu1 %v3520_v17 }
 0x3d4   :  { %3147 = vmatprep.subr.bf16.mxu1 %v3595_v22 }
 0x3d7   :  { %3148 = vmatpush3.bf16.msra.mxu1 %v3521_v41 }
 0x3d8   :  { %3149 = vmatprep.subr.bf16.mxu1 %v3595_v22 }
 0x3db   :  { %3150 = vmatpush3.bf16.msra.mxu1 %v3522_v42 }
 0x3dc   :  { %3151 = vmatprep.subr.bf16.mxu1 %v3595_v22 }
 0x3df   :  { %3152 = vmatpush3.bf16.msra.mxu1 %v3523_v43 }
 0x3e0   :  { %3157 = vmatprep.subr.bf16.mxu1 %v3595_v22 }
 0x3e2   :  { %3154 = vmatmul.mubr.bf16.vlgmr.msra.gmra.mrb[40].mxu1 %v2356_v44 }
 0x3e3   :  { %3158 = vmatpush3.bf16.msra.mxu1 %v3524_v32  ;;  %3173 = vmatprep.mubr.msk.bf16.mxu1 %vm3596_vm2, %v3595_v22 }
 0x3e4   :  { %3159 = vmatprep.subr.bf16.mxu1 %v3595_v22 }
 0x3e7   :  { %3160 = vmatpush3.bf16.msra.mxu1 %v3525_v45 }
 0x3e8   :  { %3161 = vmatprep.subr.bf16.mxu1 %v3595_v22 }
 0x3eb   :  { %3162 = vmatpush3.bf16.msra.mxu1 %v3526_v31 }
 0x3ec   :  { %3163 = vmatprep.subr.bf16.mxu1 %v3595_v22 }
 0x3ef   :  { %3164 = vmatpush3.bf16.msra.mxu1 %v3527_v34 }
 0x3f0   :  { %3165 = vmatprep.subr.bf16.mxu1 %v3595_v22 }
 0x3f3   :  { %3166 = vmatpush3.bf16.msra.mxu1 %v3528_v39 }
 0x3f4   :  { %3167 = vmatprep.subr.bf16.mxu1 %v3595_v22 }
 0x3f7   :  { %3168 = vmatpush3.bf16.msra.mxu1 %v3529_v46 }
 0x3f8   :  { %3169 = vmatprep.subr.bf16.mxu1 %v3595_v22 }
 0x3fb   :  { %3170 = vmatpush3.bf16.msra.mxu1 %v3530_v47 }
 0x3fc   :  { %3171 = vmatprep.subr.bf16.mxu1 %v3595_v22 }
 0x3ff   :  { %3172 = vmatpush3.bf16.msra.mxu1 %v3531_v49 }
 0x400   :  { %3197 = vmatprep.subr.bf16.mxu1 %v3595_v22 }
 0x402   :  { %3174 = vmatmul.mubr.bf16.vlgmr.msra.gmra.mrb[44].mxu1 %v2470_v51 }
 0x403   :  { %3198 = vmatpush3.bf16.msra.mxu1 %v3532_v50  ;;  %3213 = vmatprep.mubr.msk.bf16.mxu1 %vm3596_vm2, %v3595_v22 }
 0x404   :  { %3199 = vmatprep.subr.bf16.mxu1 %v3595_v22 }
 0x407   :  { %3200 = vmatpush3.bf16.msra.mxu1 %v3533_v52 }
 0x408   :  { %3201 = vmatprep.subr.bf16.mxu1 %v3595_v22 }
 0x40b   :  { %3202 = vmatpush3.bf16.msra.mxu1 %v3534_v53 }
 0x40c   :  { %3203 = vmatprep.subr.bf16.mxu1 %v3595_v22 }
 0x40f   :  { %3204 = vmatpush3.bf16.msra.mxu1 %v3535_v55 }
 0x410   :  { %3205 = vmatprep.subr.bf16.mxu1 %v3595_v22 }
 0x413   :  { %3206 = vmatpush3.bf16.msra.mxu1 %v3536_v56 }
 0x414   :  { %3207 = vmatprep.subr.bf16.mxu1 %v3595_v22 }
 0x417   :  { %3208 = vmatpush3.bf16.msra.mxu1 %v3537_v57 }
 0x418   :  { %3209 = vmatprep.subr.bf16.mxu1 %v3595_v22 }
 0x41b   :  { %3210 = vmatpush3.bf16.msra.mxu1 %v3538_v58 }
 0x41c   :  { %3211 = vmatprep.subr.bf16.mxu1 %v3595_v22 }
 0x41f   :  { %3212 = vmatpush3.bf16.msra.mxu1 %v3539_v35 }
 0x422   :  { %3214 = vmatmul.mubr.bf16.vlgmr.msra.gmra.mrb[48].mxu1 %v2698_v36 }
 0x455   :  { %v2141_v59 = vpop.f32.mrb[28].mxu1 }
 0x456   :  { %v3095_v61 = vpop.f32.mrb[29].mxu1 }
 0x457   :  { %v2144_v62 = vpop.f32.mrb[30].mxu1 }
 0x458   :  { %v3096_v54 = vpop.f32.mrb[31].mxu1 }
 0x475   :  { %v2229_v63 = vpop.f32.mrb[32].mxu1  ;;  %v2684_v1 = vpop.f32.mrb[56].mxu0 }
 0x476   :  { %v2230_v2 = vadd.f32 %v2229_v63, %v2141_v59  ;;  %v3115_v3 = vpop.f32.mrb[33].mxu1  ;;  %v3195_v4 = vpop.f32.mrb[57].mxu0 }
 0x477   :  { %v2232_v6 = vpop.f32.mrb[34].mxu1  ;;  %v2687_v7 = vpop.f32.mrb[58].mxu0 }
 0x478   :  { %v3116_v8 = vpop.f32.mrb[35].mxu1  ;;  %v3196_v9 = vpop.f32.mrb[59].mxu0 }
 0x495   :  { %v2342_v10 = vpop.f32.mrb[36].mxu1 }
 0x496   :  { %v2348_v22 = vadd.f32 %v2342_v10, %v2230_v2  ;;  %v3135_v11 = vpop.f32.mrb[37].mxu1 }
 0x497   :  { %v2345_v12 = vpop.f32.mrb[38].mxu1 }
 0x498   :  { %v3136_v14 = vpop.f32.mrb[39].mxu1 }
 0x4b5   :  { %v2456_v16 = vpop.f32.mrb[40].mxu1 }
 0x4b6   :  { %v2462_v40 = vadd.f32 %v2456_v16, %v2348_v22  ;;  %v3155_v18 = vpop.f32.mrb[41].mxu1 }
 0x4b7   :  { %v2459_v60 = vpop.f32.mrb[42].mxu1 }
 0x4b8   :  { %v3156_v33 = vpop.f32.mrb[43].mxu1 }
 0x4d5   :  { %v2570_v0 = vpop.f32.mrb[44].mxu1 }
 0x4d6   :  { %v2576_v5 = vadd.f32 %v2570_v0, %v2462_v40  ;;  %v3175_v13 = vpop.f32.mrb[45].mxu1 }
 0x4d7   :  { %v2573_v15 = vpop.f32.mrb[46].mxu1 }
 0x4d8   :  { %v3176_v25 = vpop.f32.mrb[47].mxu1  ;;  %v2690_v19 = vadd.f32 %v2684_v1, %v2576_v5 }
 0x4f5   :  { %v2798_v48 = vpop.f32.mrb[48].mxu1 }
 0x4f6   :  { %v2804_v20 = vadd.f32 %v2798_v48, %v2690_v19  ;;  %v3215_v21 = vpop.f32.mrb[49].mxu1 }
 0x4f7   :  { %v2801_v23 = vpop.f32.mrb[50].mxu1 }
 0x4f8   :  { %v2812_v24 = vadd.f32 %v3013_v26, %v2804_v20  ;;  %v3216_v27 = vpop.f32.mrb[51].mxu1 }
 0x4fa   :  { %2813 = vst [vmem:[%s4305_s7] sm:$0xff] %v2812_v24 }
 0x4fb   :  { %2818 = vsyncpa [#allocation6], 1 }
 0x4fc   :  { %2819 = vsyncpa [#allocation8], 1 }

</bundles_post_ra>
